<compile_context>
chip_gen: v5e
topology: v5e:2x2
jax: 0.10.0
libtpu: 0.0.40
codegen_flags: <defaults>
</compile_context>

<pallas_src>
import jax
import jax.numpy as jnp
import numpy as np
from jax.experimental import pallas as pl
from jax.experimental.pallas import tpu as pltpu

CHN_MID = 32       # hidden channels of the MLP
EPS = 0.1
NEG_SLOPE = 0.2

GROUPS = 8         # pixel groups packed into one MXU pass (block-diag weights)
N_FEAT = 4         # folded input features: [d0, d1, d0/(d1+eps), d1/(d0+eps)]
LANES = 128        # TPU lane width
MAX_TILE_C = 4096  # max lane-columns per grid step (=> up to 32768 px / step)


def _leaky_relu(x):
    return jnp.where(x > 0, x, NEG_SLOPE * x)


def dist2logit_kernel(d0_ref, d1_ref, w1_ref, b1_ref, w2_ref, b2_ref,
                      w3_ref, b3_ref, o_ref):
    # d0_ref, d1_ref, o_ref : (GROUPS, tile_c)   -- pixels on lanes
    # w1_ref : (256, 32)  bf16  block-diag packed, folded conv1 (8 x [32x4])
    # b1_ref : (256, 1)   f32
    # w2_ref : (256, 256) bf16  block-diag packed conv2 (8 x [32x32])
    # b2_ref : (256, 1)   f32
    # w3_ref : (8, 256)   f32   packed conv3 (row g reads group g's 32 chans)
    # b3_ref : (1, 1)     f32
    d0 = d0_ref[...]
    d1 = d1_ref[...]

    # 4 folded input features per pixel; divides use the EUP reciprocal
    # (approx is fine: the result is cast to bf16 for the MXU anyway).
    r0 = pl.reciprocal(d0 + EPS, approx=True)
    r1 = pl.reciprocal(d1 + EPS, approx=True)
    # x[k*8 + g, p] = feature k of pixel-group g   -> (32, tile_c) bf16
    x = jnp.concatenate([d0, d1, d0 * r1, d1 * r0],
                        axis=0).astype(jnp.bfloat16)

    # Conv1x1(5->32) folded+packed: (256,32) @ (32,tile_c) bf16 -> f32 acc.
    h = jnp.dot(w1_ref[...], x, preferred_element_type=jnp.float32)
    h = _leaky_relu(h + b1_ref[...])

    # Conv1x1(32->32), packed bf16 MXU matmul with f32 accumulation.
    h = jnp.dot(w2_ref[...], h.astype(jnp.bfloat16),
                preferred_element_type=jnp.float32)
    h = _leaky_relu(h + b2_ref[...])

    # Conv1x1(32->1), packed: (8,256) @ (256,tile_c) -> (8,tile_c) logits.
    logit = jnp.dot(w3_ref[...], h, preferred_element_type=jnp.float32)
    o_ref[...] = jax.nn.sigmoid(logit + b3_ref[...]).astype(o_ref.dtype)


def _pick_tile_c(mc):
    """Largest lane-tile (multiple of 128) dividing mc, capped so large
    inputs still get >=2 grid steps (megacore split) and every tile stays
    well inside VMEM on all TPU generations."""
    q_total = mc // LANES
    target = min(MAX_TILE_C, max(LANES, (mc // 2) // LANES * LANES))
    q_cap = max(1, min(q_total, target // LANES))
    for q in range(q_cap, 0, -1):
        if q_total % q == 0:
            return q * LANES
    return LANES


def _pack_params(params):
    """Pack PyTorch-layout (out, in) 1x1-conv weights 8-way block-diagonally
    so one MXU pass handles 8 pixel groups with a 256-deep contraction.
    The (d0 - d1) feature is folded into conv1's weights."""
    w1, b1, w2, b2, w3, b3 = params
    w1 = w1.astype(jnp.float32)
    # h1 = w0*d0 + w1*d1 + w2*(d0-d1) + w3*d0/(d1+e) + w4*d1/(d0+e) + b1
    #    = (w0+w2)*d0 + (w1-w2)*d1 + w3*r + w4*r' + b1
    w1f = jnp.stack([w1[:, 0] + w1[:, 2], w1[:, 1] - w1[:, 2],
                     w1[:, 3], w1[:, 4]], axis=1)                # (32, 4)
    eye = jnp.eye(GROUPS, dtype=jnp.float32)
    big = GROUPS * CHN_MID
    # x rows are ordered k*GROUPS + g ; hidden rows are ordered g*CHN_MID + c.
    w1_big = jnp.einsum('ck,gh->gckh', w1f, eye)
    w1_big = w1_big.reshape(big, GROUPS * N_FEAT).astype(jnp.bfloat16)
    w2_big = jnp.einsum('oi,gh->gohi', w2.astype(jnp.float32), eye)
    w2_big = w2_big.reshape(big, big).astype(jnp.bfloat16)
    w3_big = jnp.einsum('i,gh->ghi', w3.reshape(-1).astype(jnp.float32), eye)
    w3_big = w3_big.reshape(GROUPS, big)
    b1_big = jnp.tile(b1.reshape(1, CHN_MID), (GROUPS, 1)).reshape(big, 1)
    b2_big = jnp.tile(b2.reshape(1, CHN_MID), (GROUPS, 1)).reshape(big, 1)
    b3_2d = jnp.asarray(b3, jnp.float32).reshape(1, 1)
    return w1_big, b1_big, w2_big, b2_big, w3_big, b3_2d


def dist2logit_forward(d0, d1, params):
    """d0, d1: (N, 1, H, W). Returns sigmoid logits of shape (N, 1, H, W)."""
    orig_shape = d0.shape
    N, C, H, W = orig_shape
    assert C == 1 and d1.shape == orig_shape
    M = N * H * W

    # Flatten pixels; pad only the small tail (<1024 px) so the slab becomes
    # (GROUPS, mc) with mc a multiple of 128. Zero pads are safe since EPS>0.
    chunk = GROUPS * LANES
    m_pad = ((M + chunk - 1) // chunk) * chunk
    d0f = d0.reshape(M).astype(jnp.float32)
    d1f = d1.reshape(M).astype(jnp.float32)
    if m_pad != M:
        d0f = jnp.pad(d0f, (0, m_pad - M))
        d1f = jnp.pad(d1f, (0, m_pad - M))
    mc = m_pad // GROUPS
    d0g = d0f.reshape(GROUPS, mc)
    d1g = d1f.reshape(GROUPS, mc)

    tile_c = _pick_tile_c(mc)
    grid = (mc // tile_c,)

    w1_big, b1_big, w2_big, b2_big, w3_big, b3_2d = _pack_params(params)
    big = GROUPS * CHN_MID

    pix_spec = pl.BlockSpec((GROUPS, tile_c), lambda i: (0, i))
    const = lambda r, c: pl.BlockSpec((r, c), lambda i: (0, 0))

    out = pl.pallas_call(
        dist2logit_kernel,
        out_shape=jax.ShapeDtypeStruct((GROUPS, mc), jnp.float32),
        grid_spec=pltpu.PrefetchScalarGridSpec(
            num_scalar_prefetch=0,
            grid=grid,
            in_specs=[
                pix_spec,                      # d0  (8, tile_c)
                pix_spec,                      # d1  (8, tile_c)
                const(big, GROUPS * N_FEAT),   # w1 block-diag (bf16)
                const(big, 1),                 # b1
                const(big, big),               # w2 block-diag (bf16)
                const(big, 1),                 # b2
                const(GROUPS, big),            # w3 packed (f32)
                const(1, 1),                   # b3
            ],
            out_specs=pix_spec,
        ),
        compiler_params=pltpu.CompilerParams(
            dimension_semantics=("parallel",),
            vmem_limit_bytes=48 * 1024 * 1024),
    )(d0g, d1g, w1_big, b1_big, w2_big, b2_big, w3_big, b3_2d)

    return out.reshape(m_pad)[:M].reshape(orig_shape)


def init_params(key):
    """Deterministic synthetic weights in PyTorch Conv2d (out, in) layout."""
    k1, k2, k3, k4, k5, k6 = jax.random.split(key, 6)
    w1 = jax.random.normal(k1, (CHN_MID, 5), jnp.float32) * 0.05
    b1 = jax.random.normal(k2, (CHN_MID,), jnp.float32) * 0.05
    w2 = jax.random.normal(k3, (CHN_MID, CHN_MID), jnp.float32) * 0.05
    b2 = jax.random.normal(k4, (CHN_MID,), jnp.float32) * 0.05
    w3 = jax.random.normal(k5, (CHN_MID,), jnp.float32) * 0.1
    b3 = jax.random.normal(k6, (), jnp.float32) * 0.05
    return (w1, b1, w2, b2, w3, b3)


def reference_forward(d0, d1, params):
    """Pure-JAX f32 reference with the exact module semantics."""
    w1, b1, w2, b2, w3, b3 = params
    shape = d0.shape
    d0f = d0.reshape(-1, 1).astype(jnp.float32)
    d1f = d1.reshape(-1, 1).astype(jnp.float32)
    x = jnp.concatenate(
        [d0f, d1f, d0f - d1f, d0f / (d1f + EPS), d1f / (d0f + EPS)], axis=1)
    h = _leaky_relu(x @ w1.T + b1)
    h = _leaky_relu(h @ w2.T + b2)
    logit = h @ w3.reshape(CHN_MID, 1) + b3
    return jax.nn.sigmoid(logit).reshape(shape)


if __name__ == "__main__":
    key = jax.random.PRNGKey(0)
    kp, k0, k1v = jax.random.split(key, 3)
    params = init_params(kp)

    N, H, W = 2, 16, 16
    # LPIPS distances are non-negative; use abs of normals.
    d0 = jnp.abs(jax.random.normal(k0, (N, 1, H, W), jnp.float32))
    d1 = jnp.abs(jax.random.normal(k1v, (N, 1, H, W), jnp.float32))

    out = jax.block_until_ready(dist2logit_forward(d0, d1, params))
    ref = reference_forward(d0, d1, params)

    assert out.shape == (N, 1, H, W)
    # conv1/conv2 run in bf16 (f32 accumulate) inside the kernel, so compare
    # with a tolerance that absorbs bf16 quantization of a sigmoid output.
    assert np.allclose(np.asarray(out), np.asarray(ref), rtol=1e-2, atol=1e-2), (
        "max abs diff = %g"
        % float(np.max(np.abs(np.asarray(out) - np.asarray(ref)))))
    print("KERNEL_OK")
</pallas_src>

<mosaic_0001>
module attributes {stable_mosaic.version = 11 : i64} {
  func.func @dist2logit_kernel(%arg0: i32, %arg1: memref<8x128xf32, #tpu.memory_space<vmem>>, %arg2: memref<8x128xf32, #tpu.memory_space<vmem>>, %arg3: memref<256x32xbf16, #tpu.memory_space<vmem>>, %arg4: memref<256x1xf32, #tpu.memory_space<vmem>>, %arg5: memref<256x256xbf16, #tpu.memory_space<vmem>>, %arg6: memref<256x1xf32, #tpu.memory_space<vmem>>, %arg7: memref<8x256xf32, #tpu.memory_space<vmem>>, %arg8: memref<1x1xf32, #tpu.memory_space<vmem>>, %arg9: memref<8x128xf32, #tpu.memory_space<vmem>>) attributes {dimension_semantics = [#tpu.dimension_semantics<parallel>], iteration_bounds = array<i64: 1>, scalar_prefetch = 0 : i64, scratch_operands = 0 : i64, tpu.core_type = #tpu.core_type<tc>, window_params = [{transform_indices = @transform_0, window_bounds = array<i64: 8, 128>}, {transform_indices = @transform_1, window_bounds = array<i64: 8, 128>}, {pipeline_mode = #tpu.pipeline_mode<synchronous>, transform_indices = @transform_2, window_bounds = array<i64: 256, 32>}, {pipeline_mode = #tpu.pipeline_mode<synchronous>, transform_indices = @transform_3, window_bounds = array<i64: 256, 1>}, {pipeline_mode = #tpu.pipeline_mode<synchronous>, transform_indices = @transform_4, window_bounds = array<i64: 256, 256>}, {pipeline_mode = #tpu.pipeline_mode<synchronous>, transform_indices = @transform_5, window_bounds = array<i64: 256, 1>}, {pipeline_mode = #tpu.pipeline_mode<synchronous>, transform_indices = @transform_6, window_bounds = array<i64: 8, 256>}, {pipeline_mode = #tpu.pipeline_mode<synchronous>, transform_indices = @transform_7, window_bounds = array<i64: 1, 1>}, {transform_indices = @transform_8, window_bounds = array<i64: 8, 128>}]} {
    %c0 = arith.constant 0 : index
    %c0_0 = arith.constant 0 : index
    %0 = vector.load %arg1[%c0, %c0_0] : memref<8x128xf32, #tpu.memory_space<vmem>>, vector<8x128xf32>
    %c0_1 = arith.constant 0 : index
    %c0_2 = arith.constant 0 : index
    %1 = vector.load %arg2[%c0_1, %c0_2] : memref<8x128xf32, #tpu.memory_space<vmem>>, vector<8x128xf32>
    %cst = arith.constant 1.000000e-01 : f32
    %2 = vector.broadcast %cst : f32 to vector<8x128xf32>
    %3 = arith.addf %0, %2 : vector<8x128xf32>
    %4 = tpu.reciprocal %3 {approx = true} : vector<8x128xf32> -> vector<8x128xf32>
    %cst_3 = arith.constant 1.000000e-01 : f32
    %5 = vector.broadcast %cst_3 : f32 to vector<8x128xf32>
    %6 = arith.addf %1, %5 : vector<8x128xf32>
    %7 = tpu.reciprocal %6 {approx = true} : vector<8x128xf32> -> vector<8x128xf32>
    %8 = arith.mulf %0, %7 : vector<8x128xf32>
    %9 = arith.mulf %1, %4 : vector<8x128xf32>
    %10 = tpu.concatenate %0, %1, %8, %9 in 0 : vector<8x128xf32>, vector<8x128xf32>, vector<8x128xf32>, vector<8x128xf32> -> vector<32x128xf32>
    %11 = arith.truncf %10 : vector<32x128xf32> to vector<32x128xbf16>
    %c0_4 = arith.constant 0 : index
    %c0_5 = arith.constant 0 : index
    %12 = vector.load %arg3[%c0_4, %c0_5] : memref<256x32xbf16, #tpu.memory_space<vmem>>, vector<256x32xbf16>
    %cst_6 = arith.constant dense<0.000000e+00> : vector<256x128xf32>
    %13 = tpu.matmul %12, %11, %cst_6 {dimension_numbers = #tpu.dot_dimension_numbers<[1], [0], [0], [1], [0, 0, 1, 1], [], []>} : vector<256x32xbf16>, vector<32x128xbf16>, vector<256x128xf32> -> vector<256x128xf32>
    %c0_7 = arith.constant 0 : index
    %c0_8 = arith.constant 0 : index
    %14 = vector.load %arg4[%c0_7, %c0_8] : memref<256x1xf32, #tpu.memory_space<vmem>>, vector<256x1xf32>
    %15 = vector.broadcast %14 : vector<256x1xf32> to vector<256x128xf32>
    %16 = arith.addf %13, %15 : vector<256x128xf32>
    %cst_9 = arith.constant 0.000000e+00 : f32
    %17 = vector.broadcast %cst_9 : f32 to vector<256x128xf32>
    %18 = arith.cmpf ogt, %16, %17 : vector<256x128xf32>
    %cst_10 = arith.constant 2.000000e-01 : f32
    %19 = vector.broadcast %cst_10 : f32 to vector<256x128xf32>
    %20 = arith.mulf %19, %16 : vector<256x128xf32>
    %21 = arith.select %18, %16, %20 : vector<256x128xi1>, vector<256x128xf32>
    %c0_11 = arith.constant 0 : index
    %c0_12 = arith.constant 0 : index
    %22 = vector.load %arg5[%c0_11, %c0_12] : memref<256x256xbf16, #tpu.memory_space<vmem>>, vector<256x256xbf16>
    %23 = arith.truncf %21 : vector<256x128xf32> to vector<256x128xbf16>
    %cst_13 = arith.constant dense<0.000000e+00> : vector<256x128xf32>
    %24 = tpu.matmul %22, %23, %cst_13 {dimension_numbers = #tpu.dot_dimension_numbers<[1], [0], [0], [1], [0, 0, 1, 1], [], []>} : vector<256x256xbf16>, vector<256x128xbf16>, vector<256x128xf32> -> vector<256x128xf32>
    %c0_14 = arith.constant 0 : index
    %c0_15 = arith.constant 0 : index
    %25 = vector.load %arg6[%c0_14, %c0_15] : memref<256x1xf32, #tpu.memory_space<vmem>>, vector<256x1xf32>
    %26 = vector.broadcast %25 : vector<256x1xf32> to vector<256x128xf32>
    %27 = arith.addf %24, %26 : vector<256x128xf32>
    %cst_16 = arith.constant 0.000000e+00 : f32
    %28 = vector.broadcast %cst_16 : f32 to vector<256x128xf32>
    %29 = arith.cmpf ogt, %27, %28 : vector<256x128xf32>
    %cst_17 = arith.constant 2.000000e-01 : f32
    %30 = vector.broadcast %cst_17 : f32 to vector<256x128xf32>
    %31 = arith.mulf %30, %27 : vector<256x128xf32>
    %32 = arith.select %29, %27, %31 : vector<256x128xi1>, vector<256x128xf32>
    %c0_18 = arith.constant 0 : index
    %c0_19 = arith.constant 0 : index
    %33 = vector.load %arg7[%c0_18, %c0_19] : memref<8x256xf32, #tpu.memory_space<vmem>>, vector<8x256xf32>
    %cst_20 = arith.constant dense<0.000000e+00> : vector<8x128xf32>
    %34 = tpu.matmul %33, %32, %cst_20 {dimension_numbers = #tpu.dot_dimension_numbers<[1], [0], [0], [1], [0, 0, 1, 1], [], []>} : vector<8x256xf32>, vector<256x128xf32>, vector<8x128xf32> -> vector<8x128xf32>
    %c0_21 = arith.constant 0 : index
    %c0_22 = arith.constant 0 : index
    %35 = vector.load %arg8[%c0_21, %c0_22] : memref<1x1xf32, #tpu.memory_space<vmem>>, vector<1x1xf32>
    %36 = vector.broadcast %35 : vector<1x1xf32> to vector<8x128xf32>
    %37 = arith.addf %34, %36 : vector<8x128xf32>
    %38 = arith.negf %37 : vector<8x128xf32>
    %39 = math.exp %38 : vector<8x128xf32>
    %cst_23 = arith.constant 1.000000e+00 : f32
    %40 = vector.broadcast %cst_23 : f32 to vector<8x128xf32>
    %41 = arith.addf %40, %39 : vector<8x128xf32>
    %42 = arith.divf %40, %41 : vector<8x128xf32>
    %c0_24 = arith.constant 0 : index
    %c0_25 = arith.constant 0 : index
    %43 = vector.load %arg9[%c0_24, %c0_25] : memref<8x128xf32, #tpu.memory_space<vmem>>, vector<8x128xf32>
    tpu.vector_store %arg9[%c0_24, %c0_25], %42 {strides = array<i32>} : memref<8x128xf32, #tpu.memory_space<vmem>>, vector<8x128xf32>,
    return
  }
  func.func @transform_0(%arg0: i32) -> (i32, i32) {
    %c0_i32 = arith.constant 0 : i32
    %c0_i32_0 = arith.constant 0 : i32
    return %c0_i32, %arg0 : i32, i32
  }
  func.func @transform_1(%arg0: i32) -> (i32, i32) {
    %c0_i32 = arith.constant 0 : i32
    %c0_i32_0 = arith.constant 0 : i32
    return %c0_i32, %arg0 : i32, i32
  }
  func.func @transform_2(%arg0: i32) -> (i32, i32) {
    %c0_i32 = arith.constant 0 : i32
    %c0_i32_0 = arith.constant 0 : i32
    %c0_i32_1 = arith.constant 0 : i32
    return %c0_i32, %c0_i32_0 : i32, i32
  }
  func.func @transform_3(%arg0: i32) -> (i32, i32) {
    %c0_i32 = arith.constant 0 : i32
    %c0_i32_0 = arith.constant 0 : i32
    %c0_i32_1 = arith.constant 0 : i32
    return %c0_i32, %c0_i32_0 : i32, i32
  }
  func.func @transform_4(%arg0: i32) -> (i32, i32) {
    %c0_i32 = arith.constant 0 : i32
    %c0_i32_0 = arith.constant 0 : i32
    %c0_i32_1 = arith.constant 0 : i32
    return %c0_i32, %c0_i32_0 : i32, i32
  }
  func.func @transform_5(%arg0: i32) -> (i32, i32) {
    %c0_i32 = arith.constant 0 : i32
    %c0_i32_0 = arith.constant 0 : i32
    %c0_i32_1 = arith.constant 0 : i32
    return %c0_i32, %c0_i32_0 : i32, i32
  }
  func.func @transform_6(%arg0: i32) -> (i32, i32) {
    %c0_i32 = arith.constant 0 : i32
    %c0_i32_0 = arith.constant 0 : i32
    %c0_i32_1 = arith.constant 0 : i32
    return %c0_i32, %c0_i32_0 : i32, i32
  }
  func.func @transform_7(%arg0: i32) -> (i32, i32) {
    %c0_i32 = arith.constant 0 : i32
    %c0_i32_0 = arith.constant 0 : i32
    %c0_i32_1 = arith.constant 0 : i32
    return %c0_i32, %c0_i32_0 : i32, i32
  }
  func.func @transform_8(%arg0: i32) -> (i32, i32) {
    %c0_i32 = arith.constant 0 : i32
    %c0_i32_0 = arith.constant 0 : i32
    return %c0_i32, %arg0 : i32, i32
  }
}

</mosaic_0001>

<bundles_post_ra>
// kernel: tpu_custom_call.1
= control target key start
LH: loop header
LB: loop body
LE: loop exit
PB: predicated region body
PF: predicated region fallthrough
CT: control target
= control target key end

     0   :  { %s2440_s0 = inlined_call_operand.vmem [shape: f32[8,128], index: 0, kind: input, shape index: {}]   ;;  %s2441_s1 = inlined_call_operand.vmem [shape: f32[8,128], index: 1, kind: input, shape index: {}]   ;;  %s2442_s2 = inlined_call_operand.vmem [shape: bf16[256,32], index: 2, kind: input, shape index: {}]   ;;  %s2443_s3 = inlined_call_operand.vmem [shape: f32[256,1], index: 3, kind: input, shape index: {}]   ;;  %s2444_s4 = inlined_call_operand.vmem [shape: bf16[256,256], index: 4, kind: input, shape index: {}]   ;;  %s2445_s5 = inlined_call_operand.vmem [shape: f32[256,1], index: 5, kind: input, shape index: {}]   ;;  %s2446_s6 = inlined_call_operand.vmem [shape: f32[8,256], index: 6, kind: input, shape index: {}]   ;;  %s2447_s7 = inlined_call_operand.<no memory space> [shape: f32[1,1], index: 7, kind: input, shape index: {}]   ;;  %s2448_s8 = inlined_call_operand.hbm [shape: f32[8,128], index: 8, kind: output, shape index: {}]  }
   0x1   :  { %v13_v0 = vstv %s2447_s7 }
   0x2   :  { %14 = vst [vmem:[#allocation2] sm:$0x1] %v13_v0 }
   0x3   :  { %v105_v1 = vld [vmem:[%s2443_s3 + $0xf0] sm:$0xff]  ;;  %v1655_v3 = vmov 0   ;;  %v103_v4 = vld [vmem:[%s2443_s3 + $0xe0] sm:$0xff] }
   0x4   :  { %v89_v2 = vld [vmem:[%s2443_s3 + $0x70] sm:$0xff]  ;;  %1618 = vset.pattern.permute.xlu1 %v1655_v3  ;;  %1617 = vset.pattern.permute.xlu0 %v1655_v3  ;;  %v33_v5 = vld [vmem:[%s2440_s0] sm:$0xff] }
   0x5   :  { %259 = vperm.xlu0 %1617, %v105_v1   ;;  %179 = vperm.xlu1 %1618, %v89_v2   ;;  %v34_v6 = vld [vmem:[%s2441_s1] sm:$0xff]  ;;  %v35_v7 = vadd.f32 0.1, %v33_v5 }
   0x6   :  { %1619 = vset.pattern.permute.xlu2 %v1655_v3  ;;  %v37_v8 = vadd.f32 0.1, %v34_v6 }
   0x7   :  { %249 = vperm.xlu2 %1619, %v103_v4   ;;  %1621 = vrcp.f32 %v35_v7 }
   0x8   :  { %1623 = vrcp.f32 %v37_v8 }
   0x9   :  { %15 = vsyncpa [#allocation4], 0  ;;  %v106_v9 = vld [vmem:[%s2443_s3 + $0xf8] sm:$0xff]  ;;  %v104_v11 = vld [vmem:[%s2443_s3 + $0xe8] sm:$0xff]  ;;  %v41_v19 = vpack.c.bf16 %v34_v6, %v33_v5  ;;  %vm347_vm0 = vcmask 261120   ;;  %s1331_s12 = sshll.u32 %s2448_s8, 4  ;;  %s1332_s12 = int_to_ptr.hbm [resolvable:$true] %s1331_s12 }
   0xa   :  { %v90_v10 = vld [vmem:[%s2443_s3 + $0x78] sm:$0xff]  ;;  %v88_v17 = vld [vmem:[%s2443_s3 + $0x68] sm:$0xff]  ;;  %v87_v18 = vld [vmem:[%s2443_s3 + $0x60] sm:$0xff] }
   0xb   :  { %v101_v20 = vld [vmem:[%s2443_s3 + $0xd0] sm:$0xff]  ;;  %v1549_v21 = vld [vmem:[%s2442_s2] sm:$0xff]  ;;  %v102_v22 = vld [vmem:[%s2443_s3 + $0xd8] sm:$0xff] }
   0xc   :  { %v85_v23 = vld [vmem:[%s2443_s3 + $0x50] sm:$0xff]  ;;  %v86_v24 = vld [vmem:[%s2443_s3 + $0x58] sm:$0xff]  ;;  %v99_v25 = vld [vmem:[%s2443_s3 + $0xc0] sm:$0xff] }
   0xd   :  { %v1622_v12 = vpop.eup %1621  ;;  %264 = vperm.xlu0 %1617, %v106_v9   ;;  %184 = vperm.xlu1 %1618, %v90_v10   ;;  %v100_v26 = vld [vmem:[%s2443_s3 + $0xc8] sm:$0xff]  ;;  %v83_v27 = vld [vmem:[%s2443_s3 + $0x40] sm:$0xff]  ;;  %v97_v29 = vld [vmem:[%s2443_s3 + $0xb0] sm:$0xff] }
   0xe   :  { %v1624_v13 = vpop.eup %1623  ;;  %v40_v14 = vmul.f32 %v1622_v12, %v34_v6  ;;  %v1550_v28 = vld [vmem:[%s2442_s2 + $0x8] sm:$0xff]  ;;  %v98_v31 = vld [vmem:[%s2443_s3 + $0xb8] sm:$0xff]  ;;  %v81_v33 = vld [vmem:[%s2443_s3 + $0x30] sm:$0xff] }
   0xf   :  { %v39_v15 = vmul.f32 %v1624_v13, %v33_v5  ;;  %254 = vperm.xlu2 %1619, %v104_v11   ;;  %v84_v30 = vld [vmem:[%s2443_s3 + $0x48] sm:$0xff]  ;;  %v82_v32 = vld [vmem:[%s2443_s3 + $0x38] sm:$0xff]  ;;  %v95_v34 = vld [vmem:[%s2443_s3 + $0xa0] sm:$0xff] }
  0x10   :  { %v1551_v35 = vld [vmem:[%s2442_s2 + $0x10] sm:$0xff]  ;;  %v96_v36 = vld [vmem:[%s2443_s3 + $0xa8] sm:$0xff]  ;;  %v79_v37 = vld [vmem:[%s2443_s3 + $0x20] sm:$0xff] }
  0x11   :  { %v42_v16 = vpack.c.bf16 %v40_v14, %v39_v15  ;;  %v80_v38 = vld [vmem:[%s2443_s3 + $0x28] sm:$0xff]  ;;  %v93_v39 = vld [vmem:[%s2443_s3 + $0x90] sm:$0xff]  ;;  %v94_v40 = vld [vmem:[%s2443_s3 + $0x98] sm:$0xff] }
  0x12   :  { %v77_v41 = vld [vmem:[%s2443_s3 + $0x10] sm:$0xff]  ;;  %v1552_v42 = vld [vmem:[%s2442_s2 + $0x18] sm:$0xff]  ;;  %v91_v43 = vld [vmem:[%s2443_s3 + $0x80] sm:$0xff] }
  0x13   :  { %402 = vmatpush.bf16.msra.mxu0 %v42_v16  ;;  %1597 = vmatpush.bf16.msra.mxu3 %v42_v16  ;;  %v78_v44 = vld [vmem:[%s2443_s3 + $0x18] sm:$0xff]  ;;  %v76_v45 = vld [vmem:[%s2443_s3 + $0x8] sm:$0xff]  ;;  %v75_v46 = vld [vmem:[%s2443_s3] sm:$0xff] }
  0x14   :  { %v1553_v47 = vld [vmem:[%s2442_s2 + $0x20] sm:$0xff]  ;;  %v642_v48 = vld [vmem:[%s2445_s5 + $0x68] sm:$0xff]  ;;  %v643_v49 = vld [vmem:[%s2445_s5 + $0x70] sm:$0xff] }
  0x15   :  { %174 = vperm.xlu1 %1618, %v88_v17   ;;  %169 = vperm.xlu0 %1617, %v87_v18   ;;  %v660_v50 = vld [vmem:[%s2445_s5 + $0xf8] sm:$0xff]  ;;  %v1554_v52 = vld [vmem:[%s2442_s2 + $0x28] sm:$0xff]  ;;  %v659_v56 = vld [vmem:[%s2445_s5 + $0xf0] sm:$0xff] }
  0x16   :  { %v640_v51 = vld [vmem:[%s2445_s5 + $0x58] sm:$0xff]  ;;  %v92_v53 = vld [vmem:[%s2443_s3 + $0x88] sm:$0xff]  ;;  %v657_v59 = vld [vmem:[%s2445_s5 + $0xe0] sm:$0xff] }
  0x17   :  { %403 = vmatpush.bf16.msra.mxu0 %v41_v19  ;;  %239 = vperm.xlu2 %1619, %v101_v20   ;;  %v638_v55 = vld [vmem:[%s2445_s5 + $0x48] sm:$0xff]  ;;  %v644_v57 = vld [vmem:[%s2445_s5 + $0x78] sm:$0xff]  ;;  %v637_v60 = vld [vmem:[%s2445_s5 + $0x40] sm:$0xff] }
  0x18   :  { %1598 = vmatpush.bf16.msra.mxu3 %v41_v19  ;;  %v1555_v61 = vld [vmem:[%s2442_s2 + $0x30] sm:$0xff]  ;;  %v641_v0 = vld [vmem:[%s2445_s5 + $0x60] sm:$0xff]  ;;  %v656_v3 = vld [vmem:[%s2445_s5 + $0xd8] sm:$0xff] }
  0x19   :  { %v1563_v1 = vld [vmem:[%s2442_s2 + $0x70] sm:$0xff]  ;;  %v654_v8 = vld [vmem:[%s2445_s5 + $0xc8] sm:$0xff]  ;;  %v1556_v11 = vld [vmem:[%s2442_s2 + $0x38] sm:$0xff] }
  0x1a   :  { %1404 = vmatmul.msk.bf16.vlgmr.msra.gmra.mxu0 %vm347_vm0, %v1549_v21  ;;  %v635_v2 = vld [vmem:[%s2445_s5 + $0x30] sm:$0xff]  ;;  %v634_v9 = vld [vmem:[%s2445_s5 + $0x28] sm:$0xff]  ;;  %v1564_v15 = vld [vmem:[%s2442_s2 + $0x78] sm:$0xff] }
  0x1b   :  { %1418 = vmatmul.msk.bf16.vlgmr.msra.gmra.mxu3 %vm347_vm0, %v1563_v1  ;;  %v639_v7 = vld [vmem:[%s2445_s5 + $0x50] sm:$0xff]  ;;  %v658_v14 = vld [vmem:[%s2445_s5 + $0xe8] sm:$0xff]  ;;  %v632_v16 = vld [vmem:[%s2445_s5 + $0x18] sm:$0xff] }
  0x1c   :  { %v653_v17 = vld [vmem:[%s2445_s5 + $0xc0] sm:$0xff]  ;;  %v636_v21 = vld [vmem:[%s2445_s5 + $0x38] sm:$0xff] }
  0x1d   :  { %244 = vperm.xlu0 %1617, %v102_v22   ;;  %159 = vperm.xlu1 %1618, %v85_v23   ;;  %v651_v22 = vld [vmem:[%s2445_s5 + $0xb0] sm:$0xff] }
  0x1e   :  { %v631_v23 = vld [vmem:[%s2445_s5 + $0x10] sm:$0xff] }
  0x1f   :  { %164 = vperm.xlu2 %1619, %v86_v24   ;;  %v1557_v24 = vld [vmem:[%s2442_s2 + $0x40] sm:$0xff] }
  0x25   :  { %229 = vperm.xlu0 %1617, %v99_v25   ;;  %234 = vperm.xlu1 %1618, %v100_v26  }
  0x27   :  { %149 = vperm.xlu2 %1619, %v83_v27  }
  0x2a   :  { %1405 = vmatmul.msk.bf16.gmra.mxu0 %vm347_vm0, %v1550_v28  ;;  %v655_v28 = vld [vmem:[%s2445_s5 + $0xd0] sm:$0xff] }
  0x2b   :  { %1419 = vmatmul.msk.bf16.gmra.mxu3 %vm347_vm0, %v1564_v15 }
  0x2d   :  { %219 = vperm.xlu1 %1618, %v97_v29   ;;  %154 = vperm.xlu0 %1617, %v84_v30   ;;  %v629_v30 = vld [vmem:[%s2445_s5] sm:$0xff] }
  0x2f   :  { %224 = vperm.xlu2 %1619, %v98_v31   ;;  %v650_v31 = vld [vmem:[%s2445_s5 + $0xa8] sm:$0xff] }
  0x35   :  { %144 = vperm.xlu1 %1618, %v82_v32   ;;  %139 = vperm.xlu0 %1617, %v81_v33  }
  0x37   :  { %209 = vperm.xlu2 %1619, %v95_v34  }
  0x3a   :  { %1406 = vmatmul.msk.bf16.gmra.mxu0 %vm347_vm0, %v1551_v35  ;;  %v633_v35 = vld [vmem:[%s2445_s5 + $0x20] sm:$0xff] }
  0x3d   :  { %214 = vperm.xlu0 %1617, %v96_v36   ;;  %129 = vperm.xlu1 %1618, %v79_v37   ;;  %v647_v36 = vld [vmem:[%s2445_s5 + $0x90] sm:$0xff]  ;;  %v648_v37 = vld [vmem:[%s2445_s5 + $0x98] sm:$0xff] }
  0x3f   :  { %134 = vperm.xlu2 %1619, %v80_v38  }
  0x45   :  { %199 = vperm.xlu0 %1617, %v93_v39   ;;  %204 = vperm.xlu1 %1618, %v94_v40   ;;  %v1558_v39 = vld [vmem:[%s2442_s2 + $0x48] sm:$0xff] }
  0x47   :  { %119 = vperm.xlu2 %1619, %v77_v41  }
  0x4a   :  { %1407 = vmatmul.msk.bf16.gmra.mxu0 %vm347_vm0, %v1552_v42 }
  0x4d   :  { %189 = vperm.xlu1 %1618, %v91_v43   ;;  %124 = vperm.xlu0 %1617, %v78_v44   ;;  %v652_v43 = vld [vmem:[%s2445_s5 + $0xb8] sm:$0xff]  ;;  %v1620_v44 = vld [vmem:[#allocation2] ss:$0 sm:$0xff] }
  0x4f   :  { %194 = vperm.xlu2 %1619, %v92_v53  }
  0x55   :  { %114 = vperm.xlu1 %1618, %v76_v45   ;;  %109 = vperm.xlu0 %1617, %v75_v46   ;;  %v645_v45 = vld [vmem:[%s2445_s5 + $0x80] sm:$0xff] }
  0x57   :  { %738 = vperm.xlu2 %1619, %v644_v57  }
  0x5a   :  { %1408 = vmatmul.msk.bf16.gmra.mxu0 %vm347_vm0, %v1553_v47 }
  0x5d   :  { %728 = vperm.xlu1 %1618, %v642_v48   ;;  %733 = vperm.xlu0 %1617, %v643_v49  }
  0x5f   :  { %723 = vperm.xlu2 %1619, %v641_v0  }
  0x61   :  { %v1842_v54 = vpop.permute.xlu2 %249 }
  0x65   :  { %818 = vperm.xlu1 %1618, %v660_v50   ;;  %718 = vperm.xlu0 %1617, %v640_v51   ;;  %v630_v50 = vld [vmem:[%s2445_s5 + $0x8] sm:$0xff]  ;;  %v1559_v51 = vld [vmem:[%s2442_s2 + $0x50] sm:$0xff] }
  0x67   :  { %713 = vperm.xlu2 %1619, %v639_v7  }
  0x69   :  { %v1854_v58 = vpop.permute.xlu2 %254 }
  0x6a   :  { %1409 = vmatmul.msk.bf16.gmra.mxu0 %vm347_vm0, %v1554_v52 }
  0x6d   :  { %708 = vperm.xlu1 %1618, %v638_v55   ;;  %813 = vperm.xlu0 %1617, %v659_v56   ;;  %v649_v56 = vld [vmem:[%s2445_s5 + $0xa0] sm:$0xff] }
  0x6f   :  { %808 = vperm.xlu2 %1619, %v658_v14  }
  0x71   :  { %v1883_v4 = vpop.permute.xlu2 %239 }
  0x75   :  { %803 = vperm.xlu1 %1618, %v657_v59   ;;  %703 = vperm.xlu0 %1617, %v637_v60  }
  0x77   :  { %v1865_v62 = vpop.permute.xlu0 %259  ;;  %v1867_v63 = vpop.permute.xlu1 %179  ;;  %698 = vperm.xlu2 %1619, %v636_v21  }
  0x79   :  { %v1898_v10 = vpop.permute.xlu2 %164 }
  0x7a   :  { %1410 = vmatmul.msk.bf16.gmra.mxu0 %vm347_vm0, %v1555_v61 }
  0x7d   :  { %693 = vperm.xlu1 %1618, %v635_v2   ;;  %798 = vperm.xlu0 %1617, %v656_v3  }
  0x7f   :  { %v1885_v5 = vpop.permute.xlu0 %264  ;;  %v1887_v6 = vpop.permute.xlu1 %184  ;;  %793 = vperm.xlu2 %1619, %v655_v28  }
  0x81   :  { %v1925_v20 = vpop.permute.xlu2 %149 }
  0x85   :  { %788 = vperm.xlu1 %1618, %v654_v8   ;;  %688 = vperm.xlu0 %1617, %v634_v9   ;;  %v646_v9 = vld [vmem:[%s2445_s5 + $0x88] sm:$0xff] }
  0x87   :  { %v1903_v12 = vpop.permute.xlu1 %174  ;;  %v1905_v13 = vpop.permute.xlu0 %169  ;;  %683 = vperm.xlu2 %1619, %v633_v35  }
  0x89   :  { %v1948_v29 = vpop.permute.xlu2 %224 }
  0x8a   :  { %1411 = vmatmul.msk.bf16.gmra.mxu0 %vm347_vm0, %v1556_v11 }
  0x8d   :  { %678 = vperm.xlu1 %1618, %v632_v16   ;;  %783 = vperm.xlu0 %1617, %v653_v17  }
  0x8f   :  { %v1921_v18 = vpop.permute.xlu0 %244  ;;  %v1923_v19 = vpop.permute.xlu1 %159  ;;  %778 = vperm.xlu2 %1619, %v652_v43  }
  0x91   :  { %v1972_v38 = vpop.permute.xlu2 %209 }
  0x95   :  { %773 = vperm.xlu1 %1618, %v651_v22   ;;  %673 = vperm.xlu0 %1617, %v631_v23  }
  0x97   :  { %v1939_v25 = vpop.f32.mrf.mxu0  ;;  %v1941_v26 = vpop.permute.xlu0 %229  ;;  %668 = vperm.xlu2 %1619, %v630_v50  }
  0x98   :  { %v1943_v27 = vpop.permute.xlu1 %234 }
  0x99   :  { %v135_v46 = vpop.permute.xlu2 %134 }
  0x9a   :  { %1412 = vmatmul.msk.bf16.gmra.mxu0 %vm347_vm0, %v1557_v24  ;;  %v1560_v24 = vld [vmem:[%s2442_s2 + $0x58] sm:$0xff] }
  0x9d   :  { %663 = vperm.xlu1 %1618, %v629_v30   ;;  %768 = vperm.xlu0 %1617, %v650_v31  }
  0x9f   :  { %v1957_v32 = vpop.f32.mrf.mxu0  ;;  %v1959_v33 = vpop.permute.xlu0 %154  ;;  %763 = vperm.xlu2 %1619, %v649_v56  }
  0xa0   :  { %v1961_v34 = vpop.permute.xlu1 %219 }
  0xa1   :  { %v120_v57 = vpop.permute.xlu2 %119 }
  0xa5   :  { %753 = vperm.xlu1 %1618, %v647_v36   ;;  %758 = vperm.xlu0 %1617, %v648_v37  }
  0xa7   :  { %v410_v40 = vpop.f32.mrf.mxu0  ;;  %v140_v41 = vpop.permute.xlu0 %139  ;;  %748 = vperm.xlu2 %1619, %v646_v9  }
  0xa8   :  { %v145_v42 = vpop.permute.xlu1 %144  ;;  %v411_v59 = vadd.f32 %v410_v40, %v120_v57  ;;  %v1562_v57 = vld [vmem:[%s2442_s2 + $0x68] sm:$0xff] }
  0xaa   :  { %1413 = vmatmul.msk.bf16.gmra.mxu0 %vm347_vm0, %v1558_v39  ;;  %v519_v1 = vmul.f32 0.2, %v411_v59  ;;  %vm487_vm2 = vcmp.gt.f32.partialorder %v411_v59, 0.0 }
  0xac   :  { %v551_v17 = vsel %vm487_vm2, %v411_v59, %v519_v1 }
  0xad   :  { %1261 = vperm.xlu1 %1618, %v1620_v44   ;;  %743 = vperm.xlu0 %1617, %v645_v45  }
  0xaf   :  { %v412_v47 = vpop.f32.mrf.mxu0  ;;  %v1984_v48 = vpop.permute.xlu0 %214 }
  0xb0   :  { %v130_v49 = vpop.permute.xlu1 %129 }
  0xb7   :  { %v415_v52 = vpop.f32.mrf.mxu0  ;;  %v1992_v53 = vpop.permute.xlu0 %199 }
  0xb8   :  { %v1994_v55 = vpop.permute.xlu1 %204  ;;  %v416_v60 = vadd.f32 %v415_v52, %v130_v49  ;;  %v1561_v52 = vld [vmem:[%s2442_s2 + $0x60] sm:$0xff] }
  0xba   :  { %1414 = vmatmul.msk.bf16.gmra.mxu0 %vm347_vm0, %v1559_v51  ;;  %v521_v2 = vmul.f32 0.2, %v416_v60  ;;  %vm489_vm1 = vcmp.gt.f32.partialorder %v416_v60, 0.0 }
  0xbc   :  { %v553_v15 = vsel %vm489_vm1, %v416_v60, %v521_v2 }
  0xbf   :  { %v417_v61 = vpop.f32.mrf.mxu0  ;;  %v125_v0 = vpop.permute.xlu0 %124 }
  0xc0   :  { %v418_v3 = vadd.f32 %v417_v61, %v135_v46  ;;  %v2000_v7 = vpop.permute.xlu1 %189  ;;  %v413_v8 = vadd.f32 %v412_v47, %v125_v0  ;;  %v475_v61 = vpop.f32.mrf.mxu3 }
  0xc2   :  { %v522_v11 = vmul.f32 0.2, %v418_v3  ;;  %v520_v14 = vmul.f32 0.2, %v413_v8  ;;  %vm490_vm3 = vcmp.gt.f32.partialorder %v418_v3, 0.0  ;;  %vm488_vm4 = vcmp.gt.f32.partialorder %v413_v8, 0.0 }
  0xc4   :  { %v554_v16 = vsel %vm490_vm3, %v418_v3, %v522_v11  ;;  %v552_v21 = vsel %vm488_vm4, %v413_v8, %v520_v14 }
  0xc5   :  { %v2005_v22 = vpack.c.bf16 %v554_v16, %v553_v15  ;;  %v2007_v23 = vpack.c.bf16 %v552_v21, %v551_v17 }
  0xc7   :  { %v420_v28 = vpop.f32.mrf.mxu0  ;;  %v110_v30 = vpop.permute.xlu0 %109 }
  0xc8   :  { %v115_v31 = vpop.permute.xlu1 %114  ;;  %v406_v35 = vadd.f32 %v1939_v25, %v110_v30  ;;  %v421_v40 = vadd.f32 %v420_v28, %v140_v41  ;;  %v477_v1 = vpop.f32.mrf.mxu3 }
  0xc9   :  { %v408_v36 = vadd.f32 %v1957_v32, %v115_v31 }
  0xca   :  { %v517_v37 = vmul.f32 0.2, %v406_v35  ;;  %1415 = vmatmul.msk.bf16.gmra.mxu0 %vm347_vm0, %v1560_v24  ;;  %vm485_vm5 = vcmp.gt.f32.partialorder %v406_v35, 0.0  ;;  %v523_v47 = vmul.f32 0.2, %v421_v40  ;;  %vm491_vm7 = vcmp.gt.f32.partialorder %v421_v40, 0.0 }
  0xcb   :  { %v518_v39 = vmul.f32 0.2, %v408_v36  ;;  %vm486_vm6 = vcmp.gt.f32.partialorder %v408_v36, 0.0 }
  0xcc   :  { %v549_v43 = vsel %vm485_vm5, %v406_v35, %v517_v37  ;;  %v555_v25 = vsel %vm491_vm7, %v421_v40, %v523_v47 }
  0xcd   :  { %v550_v44 = vsel %vm486_vm6, %v408_v36, %v518_v39  ;;  %v478_v39 = vadd.f32 %v477_v1, %v1854_v58 }
  0xce   :  { %v2015_v45 = vpack.c.bf16 %v550_v44, %v549_v43 }
  0xcf   :  { %v422_v46 = vpop.f32.mrf.mxu0  ;;  %v546_v58 = vmul.f32 0.2, %v478_v39  ;;  %vm514_vm4 = vcmp.gt.f32.partialorder %v478_v39, 0.0 }
  0xd0   :  { %v423_v49 = vadd.f32 %v422_v46, %v145_v42  ;;  %v480_v8 = vpop.f32.mrf.mxu3 }
  0xd1   :  { %v481_v28 = vadd.f32 %v480_v8, %v1865_v62 }
  0xd2   :  { %v524_v50 = vmul.f32 0.2, %v423_v49  ;;  %vm492_vm8 = vcmp.gt.f32.partialorder %v423_v49, 0.0 }
  0xd3   :  { %v547_v40 = vmul.f32 0.2, %v481_v28  ;;  %vm515_vm15 = vcmp.gt.f32.partialorder %v481_v28, 0.0 }
  0xd4   :  { %v556_v51 = vsel %vm492_vm8, %v423_v49, %v524_v50 }
  0xd5   :  { %v2017_v32 = vpack.c.bf16 %v556_v51, %v555_v25  ;;  %v579_v25 = vsel %vm515_vm15, %v481_v28, %v547_v40 }
  0xd7   :  { %v425_v56 = vpop.f32.mrf.mxu0 }
  0xda   :  { %1416 = vmatmul.msk.bf16.gmra.mxu0 %vm347_vm0, %v1561_v52 }
  0xdf   :  { %v427_v41 = vpop.f32.mrf.mxu0 }
  0xe0   :  { %v428_v30 = vadd.f32 %v427_v41, %v1959_v33  ;;  %v426_v33 = vadd.f32 %v425_v56, %v1925_v20 }
  0xe2   :  { %vm494_vm1 = vcmp.gt.f32.partialorder %v428_v30, 0.0  ;;  %v525_v20 = vmul.f32 0.2, %v426_v33  ;;  %vm493_vm2 = vcmp.gt.f32.partialorder %v426_v33, 0.0 }
  0xe7   :  { %v430_v42 = vpop.f32.mrf.mxu0 }
  0xea   :  { %1417 = vmatmul.msk.bf16.gmra.mxu0 %vm347_vm0, %v1562_v57 }
  0xef   :  { %v432_v59 = vpop.f32.mrf.mxu0 }
  0xf0   :  { %v433_v14 = vadd.f32 %v432_v59, %v1898_v10  ;;  %v578_v59 = vsel %vm514_vm4, %v478_v39, %v546_v58  ;;  %v1572_v58 = vld [vmem:[%s2444_s4 + $0x34] sm:$0xf0] }
  0xf2   :  { %vm496_vm13 = vcmp.gt.f32.partialorder %v433_v14, 0.0 }
  0xf7   :  { %v435_v60 = vpop.f32.mrf.mxu0 }
  0xf8   :  { %v436_v15 = vadd.f32 %v435_v60, %v1905_v13  ;;  %v476_v13 = vadd.f32 %v475_v61, %v1842_v54  ;;  %v195_v60 = vpop.permute.xlu2 %194 }
  0xfa   :  { %v529_v31 = vmul.f32 0.2, %v436_v15  ;;  %vm497_vm12 = vcmp.gt.f32.partialorder %v436_v15, 0.0  ;;  %v545_v50 = vmul.f32 0.2, %v476_v13  ;;  %vm513_vm3 = vcmp.gt.f32.partialorder %v476_v13, 0.0 }
  0xfc   :  { %v561_v46 = vsel %vm497_vm12, %v436_v15, %v529_v31 }
  0xff   :  { %v437_v0 = vpop.f32.mrf.mxu0 }
 0x100   :  { %v438_v9 = vadd.f32 %v437_v0, %v1903_v12  ;;  %v528_v12 = vmul.f32 0.2, %v433_v14 }
 0x102   :  { %v530_v21 = vmul.f32 0.2, %v438_v9  ;;  %vm498_vm11 = vcmp.gt.f32.partialorder %v438_v9, 0.0  ;;  %v560_v54 = vsel %vm496_vm13, %v433_v14, %v528_v12 }
 0x104   :  { %v562_v37 = vsel %vm498_vm11, %v438_v9, %v530_v21 }
 0x105   :  { %v619_v49 = vpack.c.bf16 %v562_v37, %v561_v46 }
 0x107   :  { %v440_v2 = vpop.f32.mrf.mxu0 }
 0x108   :  { %v441_v3 = vadd.f32 %v440_v2, %v1867_v63  ;;  %v431_v63 = vadd.f32 %v430_v42, %v1923_v19  ;;  %v526_v19 = vmul.f32 0.2, %v428_v30  ;;  %v577_v42 = vsel %vm513_vm3, %v476_v13, %v545_v50  ;;  %v1568_v13 = vld [vmem:[%s2444_s4 + $0x14] sm:$0xf0]  ;;  %v1446_v50 = vld [vmem:[%s2444_s4 + $0x30] sm:$0xf] }
 0x109   :  { %v627_v0 = vpack.c.bf16 %v578_v59, %v577_v42 }
 0x10a   :  { %v531_v16 = vmul.f32 0.2, %v441_v3  ;;  %vm499_vm9 = vcmp.gt.f32.partialorder %v441_v3, 0.0  ;;  %v527_v44 = vmul.f32 0.2, %v431_v63  ;;  %vm495_vm14 = vcmp.gt.f32.partialorder %v431_v63, 0.0 }
 0x10b   :  { %v558_v57 = vsel %vm494_vm1, %v428_v30, %v526_v19  ;;  %v1570_v19 = vld [vmem:[%s2444_s4 + $0x24] sm:$0xf0] }
 0x10c   :  { %v563_v35 = vsel %vm499_vm9, %v441_v3, %v531_v16  ;;  %v559_v56 = vsel %vm495_vm14, %v431_v63, %v527_v44  ;;  %v557_v3 = vsel %vm493_vm2, %v426_v33, %v525_v20  ;;  %v1596_v44 = vld [vmem:[%s2444_s4 + $0xf4] sm:$0xf0] }
 0x10d   :  { %v618_v41 = vpack.c.bf16 %v560_v54, %v559_v56  ;;  %v617_v8 = vpack.c.bf16 %v558_v57, %v557_v3  ;;  %v1454_v56 = vld [vmem:[%s2444_s4 + $0x40] sm:$0xf] }
 0x10f   :  { %v442_v11 = vpop.f32.mrf.mxu0 }
 0x110   :  { %v443_v17 = vadd.f32 %v442_v11, %v1887_v6  ;;  %v482_v6 = vpop.f32.mrf.mxu3 }
 0x111   :  { %v483_v62 = vadd.f32 %v482_v6, %v1885_v5  ;;  %v1594_v6 = vld [vmem:[%s2444_s4 + $0xe4] sm:$0xf0] }
 0x112   :  { %v532_v24 = vmul.f32 0.2, %v443_v17  ;;  %vm500_vm10 = vcmp.gt.f32.partialorder %v443_v17, 0.0 }
 0x113   :  { %v548_v47 = vmul.f32 0.2, %v483_v62  ;;  %vm516_vm0 = vcmp.gt.f32.partialorder %v483_v62, 0.0 }
 0x114   :  { %v564_v10 = vsel %vm500_vm10, %v443_v17, %v532_v24  ;;  %v1422_v17 = vld [vmem:[%s2444_s4] sm:$0xf]  ;;  %v1566_v24 = vld [vmem:[%s2444_s4 + $0x4] sm:$0xf0] }
 0x115   :  { %v620_v36 = vpack.c.bf16 %v564_v10, %v563_v35  ;;  %v580_v51 = vsel %vm516_vm0, %v483_v62, %v548_v47  ;;  %v1423_v63 = vor.u32 %v1566_v24, %v1422_v17  ;;  %v1438_v62 = vld [vmem:[%s2444_s4 + $0x20] sm:$0xf] }
 0x116   :  { %v628_v5 = vpack.c.bf16 %v580_v51, %v579_v25  ;;  %v1439_v46 = vor.u32 %v1570_v19, %v1438_v62  ;;  %v1447_v25 = vor.u32 %v1572_v58, %v1446_v50  ;;  %v1580_v62 = vld [vmem:[%s2444_s4 + $0x74] sm:$0xf0]  ;;  %v1569_v19 = vld [vmem:[%s2444_s4 + $0x24] sm:$0xf]  ;;  %v1582_v50 = vld [vmem:[%s2444_s4 + $0x84] sm:$0xf0] }
 0x117   :  { %v445_v43 = vpop.f32.mrf.mxu0  ;;  %981 = vmatpush.bf16.msra.mxu1 %v620_v36  ;;  %1599 = vmatpush.bf16.msrb.mxu3 %v620_v36 }
 0x118   :  { %v446_v52 = vadd.f32 %v445_v43, %v2000_v7  ;;  %1070 = vmatpush.bf16.msra.mxu2 %v628_v5  ;;  %v1542_v43 = vld [vmem:[%s2444_s4 + $0xf0] sm:$0xf] }
 0x119   :  { %v1543_v47 = vor.u32 %v1596_v44, %v1542_v43  ;;  %v1440_v43 = vld [vmem:[%s2444_s4 + $0x28] sm:$0xf0]  ;;  %v1595_v44 = vld [vmem:[%s2444_s4 + $0xf4] sm:$0xf] }
 0x11a   :  { %v533_v1 = vmul.f32 0.2, %v446_v52  ;;  %vm501_vm5 = vcmp.gt.f32.partialorder %v446_v52, 0.0 }
 0x11b   :  { %982 = vmatpush.bf16.msra.mxu1 %v619_v49  ;;  %1600 = vmatpush.bf16.msrb.mxu3 %v619_v49 }
 0x11c   :  { %1071 = vmatpush.bf16.msra.mxu2 %v627_v0  ;;  %v565_v9 = vsel %vm501_vm5, %v446_v52, %v533_v1 }
 0x11f   :  { %v447_v61 = vpop.f32.mrf.mxu0  ;;  %983 = vmatpush.bf16.msra.mxu1 %v618_v41  ;;  %1601 = vmatpush.bf16.msrb.mxu3 %v618_v41  ;;  %v1574_v41 = vld [vmem:[%s2444_s4 + $0x44] sm:$0xf0] }
 0x120   :  { %v448_v2 = vadd.f32 %v447_v61, %v195_v60 }
 0x122   :  { %v534_v7 = vmul.f32 0.2, %v448_v2  ;;  %vm502_vm6 = vcmp.gt.f32.partialorder %v448_v2, 0.0 }
 0x123   :  { %984 = vmatpush.bf16.msra.mxu1 %v617_v8  ;;  %1602 = vmatpush.bf16.msrb.mxu3 %v617_v8 }
 0x124   :  { %v566_v11 = vsel %vm502_vm6, %v448_v2, %v534_v7 }
 0x125   :  { %v2042_v14 = vpack.c.bf16 %v566_v11, %v565_v9 }
 0x127   :  { %v450_v15 = vpop.f32.mrf.mxu0  ;;  %985 = vmatpush.bf16.msra.mxu1 %v2017_v32  ;;  %1603 = vmatpush.bf16.msrb.mxu3 %v2017_v32  ;;  %v1526_v32 = vld [vmem:[%s2444_s4 + $0xd0] sm:$0xf] }
 0x128   :  { %v451_v16 = vadd.f32 %v450_v15, %v1992_v53  ;;  %v1592_v53 = vld [vmem:[%s2444_s4 + $0xd4] sm:$0xf0] }
 0x129   :  { %v1527_v12 = vor.u32 %v1592_v53, %v1526_v32  ;;  %v1576_v32 = vld [vmem:[%s2444_s4 + $0x54] sm:$0xf0] }
 0x12a   :  { %vm503_vm7 = vcmp.gt.f32.partialorder %v451_v16, 0.0 }
 0x12b   :  { %986 = vmatpush.bf16.msra.mxu1 %v2005_v22  ;;  %1604 = vmatpush.bf16.msrb.mxu3 %v2005_v22  ;;  %v535_v22 = vmul.f32 0.2, %v451_v16 }
 0x12f   :  { %v452_v21 = vpop.f32.mrf.mxu0  ;;  %987 = vmatpush.bf16.msra.mxu1 %v2007_v23  ;;  %1605 = vmatpush.bf16.msrb.mxu3 %v2007_v23  ;;  %v567_v23 = vsel %vm503_vm7, %v451_v16, %v535_v22 }
 0x130   :  { %v453_v28 = vadd.f32 %v452_v21, %v1994_v55  ;;  %v1430_v55 = vld [vmem:[%s2444_s4 + $0x10] sm:$0xf] }
 0x131   :  { %v1431_v37 = vor.u32 %v1568_v13, %v1430_v55  ;;  %v1578_v55 = vld [vmem:[%s2444_s4 + $0x64] sm:$0xf0]  ;;  %v1567_v13 = vld [vmem:[%s2444_s4 + $0x14] sm:$0xf] }
 0x132   :  { %v536_v30 = vmul.f32 0.2, %v453_v28  ;;  %vm504_vm8 = vcmp.gt.f32.partialorder %v453_v28, 0.0 }
 0x133   :  { %988 = vmatpush.bf16.msra.mxu1 %v2015_v45  ;;  %1606 = vmatpush.bf16.msrb.mxu3 %v2015_v45  ;;  %v1534_v45 = vld [vmem:[%s2444_s4 + $0xe0] sm:$0xf] }
 0x134   :  { %v568_v31 = vsel %vm504_vm8, %v453_v28, %v536_v30  ;;  %v1535_v39 = vor.u32 %v1594_v6, %v1534_v45  ;;  %v1565_v30 = vld [vmem:[%s2444_s4 + $0x4] sm:$0xf]  ;;  %v1536_v6 = vld [vmem:[%s2444_s4 + $0xe8] sm:$0xf0] }
 0x135   :  { %v2066_v35 = vpack.c.bf16 %v568_v31, %v567_v23  ;;  %v1528_v23 = vld [vmem:[%s2444_s4 + $0xd8] sm:$0xf0]  ;;  %v1593_v45 = vld [vmem:[%s2444_s4 + $0xe4] sm:$0xf] }
 0x136   :  { %989 = vmatmul.bf16.vlgmr.msra.gmra.mxu1 %v1423_v63  ;;  %1054 = vmatmul.bf16.vlgmr.msrb.gmra.mxu3 %v1527_v12  ;;  %v1424_v63 = vld [vmem:[%s2444_s4 + $0x8] sm:$0xf0]  ;;  %v1591_v12 = vld [vmem:[%s2444_s4 + $0xd4] sm:$0xf] }
 0x137   :  { %1607 = vmatpush.bf16.msra.mxu3 %v628_v5  ;;  %v455_v10 = vpop.f32.mrf.mxu0  ;;  %v1427_v31 = vor.u32 %v1565_v30, %v1424_v63  ;;  %v1518_v30 = vld [vmem:[%s2444_s4 + $0xc0] sm:$0xf]  ;;  %v1590_v63 = vld [vmem:[%s2444_s4 + $0xc4] sm:$0xf0] }
 0x13b   :  { %1608 = vmatpush.bf16.msra.mxu3 %v627_v0 }
 0x13f   :  { %v457_v36 = vpop.f32.mrf.mxu0 }
 0x146   :  { %994 = vmatmul.bf16.gmra.mxu1 %v1431_v37  ;;  %1059 = vmatmul.bf16.gmra.mxu3 %v1535_v39  ;;  %v1539_v39 = vor.u32 %v1593_v45, %v1536_v6 }
 0x147   :  { %v460_v40 = vpop.f32.mrf.mxu0 }
 0x148   :  { %v461_v0 = vadd.f32 %v460_v40, %v1961_v34  ;;  %v1478_v40 = vld [vmem:[%s2444_s4 + $0x70] sm:$0xf] }
 0x14a   :  { %v539_v9 = vmul.f32 0.2, %v461_v0  ;;  %vm507_vm14 = vcmp.gt.f32.partialorder %v461_v0, 0.0 }
 0x14c   :  { %v571_v21 = vsel %vm507_vm14, %v461_v0, %v539_v9 }
 0x14f   :  { %v462_v33 = vpop.f32.mrf.mxu0 }
 0x150   :  { %v463_v60 = vadd.f32 %v462_v33, %v1948_v29  ;;  %v456_v29 = vadd.f32 %v455_v10, %v1972_v38  ;;  %v1462_v38 = vld [vmem:[%s2444_s4 + $0x50] sm:$0xf]  ;;  %v1531_v10 = vor.u32 %v1591_v12, %v1528_v23  ;;  %v1479_v33 = vor.u32 %v1580_v62, %v1478_v40  ;;  %v1581_v40 = vld [vmem:[%s2444_s4 + $0x84] sm:$0xf]  ;;  %v1488_v62 = vld [vmem:[%s2444_s4 + $0x88] sm:$0xf0] }
 0x151   :  { %v1463_v28 = vor.u32 %v1576_v32, %v1462_v38  ;;  %v1472_v38 = vld [vmem:[%s2444_s4 + $0x68] sm:$0xf0]  ;;  %v1519_v23 = vor.u32 %v1590_v63, %v1518_v30  ;;  %v1587_v30 = vld [vmem:[%s2444_s4 + $0xb4] sm:$0xf]  ;;  %v1512_v63 = vld [vmem:[%s2444_s4 + $0xb8] sm:$0xf0] }
 0x152   :  { %v540_v7 = vmul.f32 0.2, %v463_v60  ;;  %vm508_vm13 = vcmp.gt.f32.partialorder %v463_v60, 0.0  ;;  %v537_v17 = vmul.f32 0.2, %v456_v29  ;;  %vm505_vm0 = vcmp.gt.f32.partialorder %v456_v29, 0.0 }
 0x154   :  { %v572_v16 = vsel %vm508_vm13, %v463_v60, %v540_v7  ;;  %v569_v53 = vsel %vm505_vm0, %v456_v29, %v537_v17 }
 0x156   :  { %999 = vmatmul.bf16.gmra.mxu1 %v1439_v46  ;;  %1064 = vmatmul.bf16.gmra.mxu3 %v1543_v47  ;;  %v1544_v46 = vld [vmem:[%s2444_s4 + $0xf8] sm:$0xf0]  ;;  %v1443_v47 = vor.u32 %v1569_v19, %v1440_v43 }
 0x157   :  { %v465_v49 = vpop.f32.mrf.mxu0 }
 0x158   :  { %v466_v57 = vadd.f32 %v465_v49, %v1941_v26  ;;  %v458_v26 = vadd.f32 %v457_v36, %v1984_v48  ;;  %v624_v48 = vpack.c.bf16 %v572_v16, %v571_v21  ;;  %v1547_v49 = vor.u32 %v1595_v44, %v1544_v46 }
 0x15a   :  { %v541_v1 = vmul.f32 0.2, %v466_v57  ;;  %vm509_vm12 = vcmp.gt.f32.partialorder %v466_v57, 0.0  ;;  %v538_v34 = vmul.f32 0.2, %v458_v26  ;;  %vm506_vm15 = vcmp.gt.f32.partialorder %v458_v26, 0.0 }
 0x15c   :  { %v573_v11 = vsel %vm509_vm12, %v466_v57, %v541_v1  ;;  %v570_v24 = vsel %vm506_vm15, %v458_v26, %v538_v34  ;;  %v2190_v57 = vpop.permute.xlu2 %738  ;;  %v2216_v26 = vpop.permute.xlu0 %733 }
 0x15d   :  { %v623_v22 = vpack.c.bf16 %v570_v24, %v569_v53  ;;  %v1577_v24 = vld [vmem:[%s2444_s4 + $0x64] sm:$0xf] }
 0x15e   :  { %v1475_v32 = vor.u32 %v1577_v24, %v1472_v38 }
 0x15f   :  { %v467_v54 = vpop.f32.mrf.mxu0 }
 0x160   :  { %v468_v20 = vadd.f32 %v467_v54, %v1943_v27  ;;  %v1455_v27 = vor.u32 %v1574_v41, %v1454_v56  ;;  %v1486_v54 = vld [vmem:[%s2444_s4 + $0x80] sm:$0xf]  ;;  %v1584_v56 = vld [vmem:[%s2444_s4 + $0x94] sm:$0xf0] }
 0x161   :  { %v1487_v58 = vor.u32 %v1582_v50, %v1486_v54 }
 0x162   :  { %vm510_vm11 = vcmp.gt.f32.partialorder %v468_v20, 0.0 }
 0x164   :  { %v2206_v0 = vpop.permute.xlu2 %723  ;;  %v2228_v16 = vpop.permute.xlu0 %718 }
 0x166   :  { %1004 = vmatmul.bf16.gmra.mxu1 %v1447_v25  ;;  %v1571_v25 = vld [vmem:[%s2444_s4 + $0x34] sm:$0xf] }
 0x167   :  { %v470_v51 = vpop.f32.mrf.mxu0 }
 0x168   :  { %v471_v5 = vadd.f32 %v470_v51, %v1883_v4  ;;  %v542_v4 = vmul.f32 0.2, %v468_v20  ;;  %v1448_v51 = vld [vmem:[%s2444_s4 + $0x38] sm:$0xf0] }
 0x16a   :  { %v543_v42 = vmul.f32 0.2, %v471_v5  ;;  %vm511_vm9 = vcmp.gt.f32.partialorder %v471_v5, 0.0 }
 0x16c   :  { %v575_v2 = vsel %vm511_vm9, %v471_v5, %v543_v42  ;;  %v1451_v5 = vor.u32 %v1571_v25, %v1448_v51  ;;  %v1573_v42 = vld [vmem:[%s2444_s4 + $0x44] sm:$0xf]  ;;  %v2240_v53 = vpop.permute.xlu0 %813  ;;  %v1583_v51 = vld [vmem:[%s2444_s4 + $0x94] sm:$0xf] }
 0x16f   :  { %v472_v52 = vpop.f32.mrf.mxu0 }
 0x170   :  { %v473_v59 = vadd.f32 %v472_v52, %v1921_v18  ;;  %v574_v18 = vsel %vm510_vm11, %v468_v20, %v542_v4  ;;  %v2182_v20 = vpop.permute.xlu1 %728  ;;  %v1494_v52 = vld [vmem:[%s2444_s4 + $0x90] sm:$0xf] }
 0x171   :  { %v625_v15 = vpack.c.bf16 %v574_v18, %v573_v11  ;;  %v1495_v41 = vor.u32 %v1584_v56, %v1494_v52  ;;  %v2218_v18 = vpop.permute.xlu2 %713  ;;  %v1510_v11 = vld [vmem:[%s2444_s4 + $0xb0] sm:$0xf] }
 0x172   :  { %v544_v61 = vmul.f32 0.2, %v473_v59  ;;  %vm512_vm10 = vcmp.gt.f32.partialorder %v473_v59, 0.0 }
 0x174   :  { %v576_v3 = vsel %vm512_vm10, %v473_v59, %v544_v61  ;;  %v1456_v59 = vld [vmem:[%s2444_s4 + $0x48] sm:$0xf0]  ;;  %v1502_v61 = vld [vmem:[%s2444_s4 + $0xa0] sm:$0xf] }
 0x175   :  { %v626_v8 = vpack.c.bf16 %v576_v3, %v575_v2  ;;  %v1459_v4 = vor.u32 %v1573_v42, %v1456_v59  ;;  %v1575_v3 = vld [vmem:[%s2444_s4 + $0x54] sm:$0xf] }
 0x176   :  { %1009 = vmatmul.bf16.gmra.mxu1 %v1455_v27  ;;  %v1586_v27 = vld [vmem:[%s2444_s4 + $0xa4] sm:$0xf0] }
 0x177   :  { %1072 = vmatpush.bf16.msra.mxu2 %v626_v8  ;;  %1609 = vmatpush.bf16.msra.mxu3 %v626_v8  ;;  %v1503_v1 = vor.u32 %v1586_v27, %v1502_v61  ;;  %v1464_v8 = vld [vmem:[%s2444_s4 + $0x58] sm:$0xf0] }
 0x178   :  { %v2198_v60 = vpop.permute.xlu1 %818  ;;  %v1467_v7 = vor.u32 %v1575_v3, %v1464_v8  ;;  %v1585_v3 = vld [vmem:[%s2444_s4 + $0xa4] sm:$0xf]  ;;  %v1504_v8 = vld [vmem:[%s2444_s4 + $0xa8] sm:$0xf0] }
 0x179   :  { %v2230_v17 = vpop.permute.xlu2 %808 }
 0x17b   :  { %1073 = vmatpush.bf16.msra.mxu2 %v625_v15  ;;  %1610 = vmatpush.bf16.msra.mxu3 %v625_v15  ;;  %v1588_v15 = vld [vmem:[%s2444_s4 + $0xb4] sm:$0xf0] }
 0x17c   :  { %v1511_v34 = vor.u32 %v1588_v15, %v1510_v11  ;;  %v1507_v15 = vor.u32 %v1585_v3, %v1504_v8 }
 0x17f   :  { %1074 = vmatpush.bf16.msra.mxu2 %v624_v48  ;;  %1611 = vmatpush.bf16.msra.mxu3 %v624_v48 }
 0x180   :  { %v2208_v2 = vpop.permute.xlu1 %708 }
 0x183   :  { %1075 = vmatpush.bf16.msra.mxu2 %v623_v22  ;;  %1612 = vmatpush.bf16.msra.mxu3 %v623_v22  ;;  %v2242_v22 = vpop.permute.xlu2 %698 }
 0x186   :  { %1014 = vmatmul.bf16.gmra.mxu1 %v1463_v28 }
 0x187   :  { %1076 = vmatpush.bf16.msra.mxu2 %v2066_v35  ;;  %1613 = vmatpush.bf16.msra.mxu3 %v2066_v35  ;;  %v1470_v35 = vld [vmem:[%s2444_s4 + $0x60] sm:$0xf] }
 0x188   :  { %v1471_v36 = vor.u32 %v1578_v55, %v1470_v35  ;;  %v2220_v9 = vpop.permute.xlu1 %803  ;;  %v1480_v35 = vld [vmem:[%s2444_s4 + $0x78] sm:$0xf0] }
 0x18b   :  { %1077 = vmatpush.bf16.msra.mxu2 %v2042_v14  ;;  %1614 = vmatpush.bf16.msra.mxu3 %v2042_v14  ;;  %v1432_v14 = vld [vmem:[%s2444_s4 + $0x18] sm:$0xf0]  ;;  %v2260_v55 = vpop.permute.xlu2 %793 }
 0x18c   :  { %v1435_v37 = vor.u32 %v1567_v13, %v1432_v14 }
 0x18e   :  { %1078 = vmatmul.bf16.vlgmr.msra.gmra.mxu2 %v1427_v31  ;;  %1143 = vmatmul.bf16.vlgmr.msra.gmra.mxu3 %v1531_v10  ;;  %v2252_v31 = vpop.permute.xlu0 %703  ;;  %v1579_v10 = vld [vmem:[%s2444_s4 + $0x74] sm:$0xf] }
 0x18f   :  { %v1483_v13 = vor.u32 %v1579_v10, %v1480_v35 }
 0x190   :  { %v2232_v48 = vpop.permute.xlu1 %693 }
 0x193   :  { %v684_v6 = vpop.permute.xlu2 %683 }
 0x196   :  { %1019 = vmatmul.bf16.gmra.mxu1 %v1471_v36  ;;  %v2262_v45 = vpop.permute.xlu0 %798 }
 0x198   :  { %v2250_v12 = vpop.permute.xlu1 %788 }
 0x19b   :  { %v2272_v43 = vpop.permute.xlu2 %778 }
 0x19e   :  { %1083 = vmatmul.bf16.gmra.mxu2 %v1435_v37  ;;  %1148 = vmatmul.bf16.gmra.mxu3 %v1539_v39  ;;  %v689_v19 = vpop.permute.xlu0 %688 }
 0x1a0   :  { %v679_v14 = vpop.permute.xlu1 %678 }
 0x1a6   :  { %1024 = vmatmul.bf16.gmra.mxu1 %v1479_v33  ;;  %v1491_v33 = vor.u32 %v1581_v40, %v1488_v62  ;;  %v2276_v50 = vpop.permute.xlu0 %783  ;;  %v1589_v62 = vld [vmem:[%s2444_s4 + $0xc4] sm:$0xf] }
 0x1a8   :  { %v2264_v39 = vpop.permute.xlu1 %773 }
 0x1ae   :  { %1088 = vmatmul.bf16.gmra.mxu2 %v1443_v47  ;;  %1153 = vmatmul.bf16.gmra.mxu3 %v1547_v49  ;;  %v674_v59 = vpop.permute.xlu0 %673 }
 0x1b0   :  { %v664_v46 = vpop.permute.xlu1 %663 }
 0x1b3   :  { %v990_v29 = vpop.f32.mrf.mxu1 }
 0x1b4   :  { %v991_v47 = vadd.f32 %v990_v29, %v664_v46 }
 0x1b6   :  { %1029 = vmatmul.bf16.gmra.mxu1 %v1487_v58  ;;  %v669_v58 = vpop.permute.xlu2 %668 }
 0x1bb   :  { %v992_v21 = vpop.f32.mrf.mxu1 }
 0x1bc   :  { %v993_v52 = vadd.f32 %v992_v21, %v669_v58 }
 0x1be   :  { %1093 = vmatmul.bf16.gmra.mxu2 %v1451_v5  ;;  %v1496_v5 = vld [vmem:[%s2444_s4 + $0x98] sm:$0xf0] }
 0x1bf   :  { %v1499_v42 = vor.u32 %v1583_v51, %v1496_v5 }
 0x1c3   :  { %v995_v28 = vpop.f32.mrf.mxu1 }
 0x1c6   :  { %1034 = vmatmul.bf16.gmra.mxu1 %v1495_v41 }
 0x1cb   :  { %v997_v36 = vpop.f32.mrf.mxu1 }
 0x1ce   :  { %1098 = vmatmul.bf16.gmra.mxu2 %v1459_v4  ;;  %v996_v4 = vadd.f32 %v995_v28, %v674_v59  ;;  %v2300_v28 = vpop.f32.mrf.mxu3 }
 0x1d3   :  { %v1000_v37 = vpop.f32.mrf.mxu1 }
 0x1d4   :  { %v1001_v21 = vadd.f32 %v1000_v37, %v684_v6 }
 0x1d6   :  { %1039 = vmatmul.bf16.gmra.mxu1 %v1503_v1 }
 0x1db   :  { %v1002_v44 = vpop.f32.mrf.mxu1 }
 0x1de   :  { %1103 = vmatmul.bf16.gmra.mxu2 %v1467_v7  ;;  %v998_v7 = vadd.f32 %v997_v36, %v679_v14  ;;  %v1515_v36 = vor.u32 %v1587_v30, %v1512_v63  ;;  %v2310_v14 = vpop.f32.mrf.mxu3 }
 0x1e3   :  { %v1005_v25 = vpop.f32.mrf.mxu1 }
 0x1e4   :  { %v1006_v6 = vadd.f32 %v1005_v25, %v2232_v48 }
 0x1e6   :  { %1044 = vmatmul.bf16.gmra.mxu1 %v1511_v34 }
 0x1eb   :  { %v1007_v61 = vpop.f32.mrf.mxu1 }
 0x1ee   :  { %1108 = vmatmul.bf16.gmra.mxu2 %v1475_v32 }
 0x1f3   :  { %v1010_v34 = vpop.f32.mrf.mxu1 }
 0x1f4   :  { %v1011_v58 = vadd.f32 %v1010_v34, %v2252_v31 }
 0x1f6   :  { %1049 = vmatmul.bf16.gmra.mxu1 %v1519_v23  ;;  %v1003_v23 = vadd.f32 %v1002_v44, %v689_v19  ;;  %v1008_v19 = vadd.f32 %v1007_v61, %v2242_v22 }
 0x1fb   :  { %v2298_v32 = vpop.f32.mrf.mxu1 }
 0x1fe   :  { %1113 = vmatmul.bf16.gmra.mxu2 %v1483_v13 }
 0x203   :  { %v1015_v13 = vpop.f32.mrf.mxu1 }
 0x20b   :  { %v1017_v44 = vpop.f32.mrf.mxu1 }
 0x20e   :  { %1118 = vmatmul.bf16.gmra.mxu2 %v1491_v33  ;;  %v1520_v33 = vld [vmem:[%s2444_s4 + $0xc8] sm:$0xf0] }
 0x20f   :  { %v1523_v48 = vor.u32 %v1589_v62, %v1520_v33 }
 0x211   :  { %v1079_v49 = vpop.f32.mrf.mxu2 }
 0x212   :  { %v2274_v54 = vadd.f32 %v1079_v49, %v991_v47  ;;  %v2322_v47 = vpop.f32.mrf.mxu3 }
 0x213   :  { %v1020_v5 = vpop.f32.mrf.mxu1 }
 0x214   :  { %v1021_v62 = vadd.f32 %v1020_v5, %v2206_v0  ;;  %v1013_v0 = vadd.f32 %v2298_v32, %v2208_v2  ;;  %vm1159_vm0 = vcmp.gt.f32.partialorder %v2274_v54, 0.0 }
 0x219   :  { %v1081_v56 = vpop.f32.mrf.mxu2 }
 0x21a   :  { %v2284_v41 = vadd.f32 %v1081_v56, %v993_v52  ;;  %v2329_v52 = vpop.f32.mrf.mxu3 }
 0x21c   :  { %vm1160_vm15 = vcmp.gt.f32.partialorder %v2284_v41, 0.0 }
 0x21e   :  { %1123 = vmatmul.bf16.gmra.mxu2 %v1499_v42  ;;  %v1022_v42 = vpop.f32.mrf.mxu1 }
 0x221   :  { %v1084_v27 = vpop.f32.mrf.mxu2 }
 0x222   :  { %v2286_v1 = vadd.f32 %v1084_v27, %v996_v4  ;;  %v2331_v59 = vpop.f32.mrf.mxu3 }
 0x224   :  { %vm1161_vm14 = vcmp.gt.f32.partialorder %v2286_v1, 0.0 }
 0x226   :  { %v1025_v4 = vpop.f32.mrf.mxu1 }
 0x229   :  { %v1086_v29 = vpop.f32.mrf.mxu2 }
 0x22a   :  { %v2294_v11 = vadd.f32 %v1086_v29, %v998_v7  ;;  %v2333_v61 = vpop.f32.mrf.mxu3 }
 0x22c   :  { %vm1162_vm13 = vcmp.gt.f32.partialorder %v2294_v11, 0.0 }
 0x22e   :  { %1128 = vmatmul.bf16.gmra.mxu2 %v1507_v15  ;;  %v1027_v8 = vpop.f32.mrf.mxu1  ;;  %v2339_v15 = vpop.permute.xlu0 %768 }
 0x231   :  { %v1089_v24 = vpop.f32.mrf.mxu2 }
 0x232   :  { %v2296_v38 = vadd.f32 %v1089_v24, %v1001_v21  ;;  %v2335_v3 = vpop.f32.mrf.mxu3 }
 0x234   :  { %vm1163_vm12 = vcmp.gt.f32.partialorder %v2296_v38, 0.0 }
 0x236   :  { %v1030_v34 = vpop.f32.mrf.mxu1  ;;  %v2343_v30 = vpop.permute.xlu0 %758 }
 0x237   :  { %2449 = vst [vmem:[#allocation6_spill] sm:$0xff] %v2343_v30  ;;  %v2350_v30 = vpop.permute.xlu2 %763 }
 0x239   :  { %v1091_v10 = vpop.f32.mrf.mxu2 }
 0x23a   :  { %v2308_v35 = vadd.f32 %v1091_v10, %v1003_v23  ;;  %v2337_v29 = vpop.f32.mrf.mxu3  ;;  %v1026_v23 = vadd.f32 %v1025_v4, %v2216_v26  ;;  %v1023_v10 = vadd.f32 %v1022_v42, %v2182_v20  ;;  %v1016_v26 = vadd.f32 %v1015_v13, %v2218_v18 }
 0x23c   :  { %vm1164_vm11 = vcmp.gt.f32.partialorder %v2308_v35, 0.0 }
 0x23e   :  { %1133 = vmatmul.bf16.gmra.mxu2 %v1515_v36  ;;  %v1032_v63 = vpop.f32.mrf.mxu1  ;;  %v1028_v36 = vadd.f32 %v1027_v8, %v2190_v57  ;;  %v744_v8 = vpop.permute.xlu0 %743 }
 0x241   :  { %v1094_v37 = vpop.f32.mrf.mxu2 }
 0x242   :  { %v2313_v40 = vadd.f32 %v1094_v37, %v1006_v6  ;;  %v2341_v24 = vpop.f32.mrf.mxu3 }
 0x244   :  { %vm1165_vm10 = vcmp.gt.f32.partialorder %v2313_v40, 0.0 }
 0x246   :  { %v1035_v5 = vpop.f32.mrf.mxu1 }
 0x249   :  { %v1096_v46 = vpop.f32.mrf.mxu2 }
 0x24a   :  { %v2324_v49 = vadd.f32 %v1096_v46, %v1008_v19  ;;  %v1018_v46 = vadd.f32 %v1017_v44, %v2228_v16  ;;  %v2353_v20 = vpop.f32.mrf.mxu3  ;;  %v1031_v16 = vadd.f32 %v1030_v34, %v744_v8  ;;  %v749_v34 = vpop.permute.xlu2 %748 }
 0x24c   :  { %vm1166_vm9 = vcmp.gt.f32.partialorder %v2324_v49, 0.0 }
 0x24e   :  { %1138 = vmatmul.bf16.gmra.mxu2 %v1523_v48 }
 0x251   :  { %v1099_v25 = vpop.f32.mrf.mxu2 }
 0x252   :  { %v2327_v51 = vadd.f32 %v1099_v25, %v1011_v58 }
 0x254   :  { %vm1167_vm8 = vcmp.gt.f32.partialorder %v2327_v51, 0.0 }
 0x259   :  { %v1101_v56 = vpop.f32.mrf.mxu2 }
 0x25a   :  { %v1102_v18 = vadd.f32 %v1101_v56, %v1013_v0 }
 0x25c   :  { %v1200_v2 = vmul.f32 0.2, %v1102_v18  ;;  %vm1168_vm7 = vcmp.gt.f32.partialorder %v1102_v18, 0.0 }
 0x261   :  { %v1104_v22 = vpop.f32.mrf.mxu2 }
 0x262   :  { %v1105_v44 = vadd.f32 %v1104_v22, %v1016_v26  ;;  %v1154_v22 = vpop.f32.mrf.mxu3 }
 0x264   :  { %vm1169_vm6 = vcmp.gt.f32.partialorder %v1105_v44, 0.0 }
 0x269   :  { %v1106_v27 = vpop.f32.mrf.mxu2 }
 0x26a   :  { %v1107_v57 = vadd.f32 %v1106_v27, %v1018_v46 }
 0x26c   :  { %v1202_v13 = vmul.f32 0.2, %v1107_v57  ;;  %vm1170_vm5 = vcmp.gt.f32.partialorder %v1107_v57, 0.0 }
 0x26e   :  { %v1234_v32 = vsel %vm1170_vm5, %v1107_v57, %v1202_v13  ;;  %v754_v57 = vpop.permute.xlu1 %753  ;;  %v1192_v13 = vmul.f32 0.2, %v2284_v41 }
 0x271   :  { %v1109_v7 = vpop.f32.mrf.mxu2 }
 0x272   :  { %v1110_v48 = vadd.f32 %v1109_v7, %v1021_v62  ;;  %v2360_v62 = vpop.f32.mrf.mxu1 }
 0x274   :  { %v1203_v7 = vmul.f32 0.2, %v1110_v48  ;;  %vm1171_vm4 = vcmp.gt.f32.partialorder %v1110_v48, 0.0 }
 0x279   :  { %v1111_v31 = vpop.f32.mrf.mxu2 }
 0x27a   :  { %v1112_v33 = vadd.f32 %v1111_v31, %v1023_v10  ;;  %v1201_v10 = vmul.f32 0.2, %v1105_v44 }
 0x27c   :  { %v1204_v42 = vmul.f32 0.2, %v1112_v33  ;;  %vm1172_vm3 = vcmp.gt.f32.partialorder %v1112_v33, 0.0  ;;  %v1233_v56 = vsel %vm1169_vm6, %v1105_v44, %v1201_v10 }
 0x27e   :  { %v1236_v27 = vsel %vm1172_vm3, %v1112_v33, %v1204_v42  ;;  %v1198_v33 = vmul.f32 0.2, %v2324_v49  ;;  %v1195_v42 = vmul.f32 0.2, %v2296_v38 }
 0x280   :  { %v1230_v26 = vsel %vm1166_vm9, %v2324_v49, %v1198_v33  ;;  %v1156_v49 = vpop.f32.mrf.mxu3 }
 0x281   :  { %v1114_v21 = vpop.f32.mrf.mxu2 }
 0x282   :  { %v1115_v6 = vadd.f32 %v1114_v21, %v1026_v23 }
 0x284   :  { %v1205_v58 = vmul.f32 0.2, %v1115_v6  ;;  %vm1173_vm2 = vcmp.gt.f32.partialorder %v1115_v6, 0.0 }
 0x286   :  { %v1237_v31 = vsel %vm1173_vm2, %v1115_v6, %v1205_v58  ;;  %v1033_v6 = vadd.f32 %v1032_v63, %v749_v34  ;;  %v1197_v58 = vmul.f32 0.2, %v2313_v40 }
 0x288   :  { %v1229_v8 = vsel %vm1165_vm10, %v2313_v40, %v1197_v58  ;;  %v1193_v40 = vmul.f32 0.2, %v2286_v1 }
 0x289   :  { %v1116_v37 = vpop.f32.mrf.mxu2 }
 0x28a   :  { %v1117_v19 = vadd.f32 %v1116_v37, %v1028_v36  ;;  %v1235_v36 = vsel %vm1171_vm4, %v1110_v48, %v1203_v7  ;;  %v1199_v37 = vmul.f32 0.2, %v2327_v51  ;;  %v1232_v48 = vsel %vm1168_vm7, %v1102_v18, %v1200_v2  ;;  %v2380_v7 = vpop.f32.mrf.mxu1 }
 0x28c   :  { %vm1174_vm1 = vcmp.gt.f32.partialorder %v1117_v19, 0.0  ;;  %v1206_v25 = vmul.f32 0.2, %v1117_v19  ;;  %v1231_v63 = vsel %vm1167_vm8, %v2327_v51, %v1199_v37  ;;  %v1194_v51 = vmul.f32 0.2, %v2294_v11 }
 0x28e   :  { %v1238_v4 = vsel %vm1174_vm1, %v1117_v19, %v1206_v25  ;;  %v1196_v25 = vmul.f32 0.2, %v2308_v35  ;;  %v1226_v18 = vsel %vm1162_vm13, %v2294_v11, %v1194_v51 }
 0x28f   :  { %1264 = vmatpush.msrb.mxu3 %v1238_v4  ;;  %v1036_v4 = vadd.f32 %v1035_v5, %v754_v57  ;;  %v1068_v5 = vadd.f32 %v2333_v61, %v2198_v60  ;;  %v1063_v60 = vadd.f32 %v2329_v52, %v2230_v17  ;;  %v1191_v61 = vmul.f32 0.2, %v2274_v54  ;;  %v1255_v17 = vld [vmem:[%s2446_s6] sm:$0xff] }
 0x290   :  { %v1228_v44 = vsel %vm1164_vm11, %v2308_v35, %v1196_v25 }
 0x291   :  { %v1119_v21 = vpop.f32.mrf.mxu2  ;;  %1265 = vmatpush.msrb.mxu3 %v1237_v31  ;;  %v1227_v31 = vsel %vm1163_vm12, %v2296_v38, %v1195_v42  ;;  %v1157_v35 = vadd.f32 %v1156_v49, %v1068_v5  ;;  %v1152_v11 = vadd.f32 %v2353_v20, %v1063_v60 }
 0x292   :  { %v2357_v23 = vadd.f32 %v1119_v21, %v1031_v16  ;;  %v1066_v21 = vadd.f32 %v2331_v59, %v2240_v53  ;;  %v1061_v53 = vadd.f32 %v2322_v47, %v2220_v9  ;;  %v1042_v9 = vpop.f32.mrf.mxu1 }
 0x293   :  { %1266 = vmatpush.msrb.mxu3 %v1236_v27  ;;  %v1225_v27 = vsel %vm1161_vm14, %v2286_v1, %v1193_v40  ;;  %v1222_v59 = vmul.f32 0.2, %v1157_v35  ;;  %vm1190_vm1 = vcmp.gt.f32.partialorder %v1157_v35, 0.0  ;;  %v1058_v1 = vadd.f32 %v2310_v14, %v2262_v45 }
 0x294   :  { %v1155_v38 = vadd.f32 %v1154_v22, %v1066_v21  ;;  %v1150_v52 = vadd.f32 %v2341_v24, %v1061_v53  ;;  %v1220_v20 = vmul.f32 0.2, %v1152_v11  ;;  %vm1188_vm3 = vcmp.gt.f32.partialorder %v1152_v11, 0.0 }
 0x295   :  { %1267 = vmatpush.msrb.mxu3 %v1235_v36  ;;  %v1224_v36 = vsel %vm1160_vm15, %v2284_v41, %v1192_v13  ;;  %v1056_v41 = vadd.f32 %v2300_v28, %v2260_v55  ;;  %v1147_v47 = vadd.f32 %v2337_v29, %v1058_v1  ;;  %v1254_v34 = vsel %vm1190_vm1, %v1157_v35, %v1222_v59 }
 0x296   :  { %v1221_v2 = vmul.f32 0.2, %v1155_v38  ;;  %vm1189_vm2 = vcmp.gt.f32.partialorder %v1155_v38, 0.0  ;;  %v1219_v14 = vmul.f32 0.2, %v1150_v52  ;;  %vm1187_vm4 = vcmp.gt.f32.partialorder %v1150_v52, 0.0 }
 0x297   :  { %1268 = vmatpush.msrb.mxu3 %v1234_v32  ;;  %v1223_v32 = vsel %vm1159_vm0, %v2274_v54, %v1191_v61  ;;  %v1145_v45 = vadd.f32 %v2335_v3, %v1056_v41  ;;  %v1218_v54 = vmul.f32 0.2, %v1147_v47  ;;  %vm1186_vm5 = vcmp.gt.f32.partialorder %v1147_v47, 0.0 }
 0x298   :  { %v1253_v24 = vsel %vm1189_vm2, %v1155_v38, %v1221_v2  ;;  %v1251_v55 = vsel %vm1187_vm4, %v1150_v52, %v1219_v14  ;;  %v1043_v49 = vadd.f32 %v1042_v9, %v2339_v15  ;;  %vm1175_vm0 = vcmp.gt.f32.partialorder %v2357_v23, 0.0  ;;  %v1256_v52 = vld [vmem:[%s2446_s6 + $0x8] sm:$0xff]  ;;  %v1262_v9 = vpop.permute.xlu1 %1261  ;;  %s1656_s6 = smov [#allocation3]  }
 0x299   :  { %v1121_v19 = vpop.f32.mrf.mxu2  ;;  %1269 = vmatpush.msrb.mxu3 %v1233_v56  ;;  %v1217_v37 = vmul.f32 0.2, %v1145_v45  ;;  %vm1185_vm6 = vcmp.gt.f32.partialorder %v1145_v45, 0.0  ;;  %v1250_v28 = vsel %vm1186_vm5, %v1147_v47, %v1218_v54  ;;  %s1329_s9 = sshll.u32 %s1656_s6, 4  ;;  %s1330_s9 = int_to_ptr.vmem [resolvable:$true] %s1329_s9 }
 0x29a   :  { %v2364_v46 = vadd.f32 %v1121_v19, %v1033_v6  ;;  %v1252_v6 = vsel %vm1188_vm3, %v1152_v11, %v1220_v20  ;;  %v1045_v29 = vpop.f32.mrf.mxu1 }
 0x29b   :  { %1270 = vmatpush.msrb.mxu3 %v1232_v48  ;;  %v1249_v56 = vsel %vm1185_vm6, %v1145_v45, %v1217_v37 }
 0x29c   :  { %vm1176_vm15 = vcmp.gt.f32.partialorder %v2364_v46, 0.0 }
 0x29d   :  { %1271 = vmatpush.msrb.mxu3 %v1231_v63 }
 0x29f   :  { %1272 = vmatpush.msrb.mxu3 %v1230_v26 }
 0x2a1   :  { %v1124_v0 = vpop.f32.mrf.mxu2  ;;  %1273 = vmatpush.msrb.mxu3 %v1229_v8 }
 0x2a2   :  { %v2377_v16 = vadd.f32 %v1124_v0, %v1036_v4  ;;  %v1047_v3 = vpop.f32.mrf.mxu1  ;;  %v1046_v0 = vadd.f32 %v1045_v29, %v2264_v39 }
 0x2a3   :  { %1274 = vmatpush.msrb.mxu3 %v1228_v44  ;;  %v1048_v57 = vadd.f32 %v1047_v3, %v2272_v43 }
 0x2a4   :  { %vm1177_vm14 = vcmp.gt.f32.partialorder %v2377_v16, 0.0 }
 0x2a5   :  { %1275 = vmatpush.msrb.mxu3 %v1227_v31 }
 0x2a7   :  { %1276 = vmatpush.msrb.mxu3 %v1226_v18 }
 0x2a9   :  { %v2397_v10 = vpop.f32.mrf.mxu2  ;;  %1277 = vmatpush.msrb.mxu3 %v1225_v27 }
 0x2aa   :  { %v1050_v58 = vpop.f32.mrf.mxu1 }
 0x2ab   :  { %1278 = vmatpush.msrb.mxu3 %v1224_v36  ;;  %v1051_v26 = vadd.f32 %v1050_v58, %v2276_v50  ;;  %v1041_v50 = vadd.f32 %v2380_v7, %v2350_v30  ;;  %v1207_v36 = vmul.f32 0.2, %v2357_v23 }
 0x2ad   :  { %1279 = vmatpush.msrb.mxu3 %v1223_v32  ;;  %v1239_v2 = vsel %vm1175_vm0, %v2357_v23, %v1207_v36 }
 0x2ae   :  { %1280 = vmatmul.f32.vlgmr.msrb.gmra.mxu3 %v1255_v17 }
 0x2af   :  { %1284 = vmatpush.msra.mxu3 %v1254_v34 }
 0x2b1   :  { %1285 = vmatpush.msra.mxu3 %v1253_v24  ;;  %v1129_v22 = vpop.f32.mrf.mxu2 }
 0x2b2   :  { %v1052_v25 = vpop.f32.mrf.mxu1  ;;  %v1130_v18 = vadd.f32 %v1129_v22, %v1041_v50 }
 0x2b3   :  { %1286 = vmatpush.msra.mxu3 %v1252_v6  ;;  %v1053_v42 = vadd.f32 %v1052_v25, %v2250_v12  ;;  %v2450_v12 = vld [vmem:[#allocation6_spill] sm:$0xff] }
 0x2b4   :  { %v1038_v39 = vadd.f32 %v2360_v62, %v2450_v12  ;;  %v1211_v30 = vmul.f32 0.2, %v1130_v18  ;;  %vm1179_vm12 = vcmp.gt.f32.partialorder %v1130_v18, 0.0  ;;  %v1209_v62 = vmul.f32 0.2, %v2377_v16 }
 0x2b5   :  { %1287 = vmatpush.msra.mxu3 %v1251_v55 }
 0x2b6   :  { %v1127_v15 = vadd.f32 %v2397_v10, %v1038_v39  ;;  %v1243_v11 = vsel %vm1179_vm12, %v1130_v18, %v1211_v30  ;;  %v1208_v10 = vmul.f32 0.2, %v2364_v46  ;;  %v1241_v17 = vsel %vm1177_vm14, %v2377_v16, %v1209_v62 }
 0x2b7   :  { %1288 = vmatpush.msra.mxu3 %v1250_v28 }
 0x2b8   :  { %v1210_v27 = vmul.f32 0.2, %v1127_v15  ;;  %vm1178_vm13 = vcmp.gt.f32.partialorder %v1127_v15, 0.0  ;;  %v1240_v1 = vsel %vm1176_vm15, %v2364_v46, %v1208_v10 }
 0x2b9   :  { %1289 = vmatpush.msra.mxu3 %v1249_v56  ;;  %v1131_v19 = vpop.f32.mrf.mxu2 }
 0x2ba   :  { %v1132_v21 = vadd.f32 %v1131_v19, %v1043_v49  ;;  %v1242_v59 = vsel %vm1178_vm13, %v1127_v15, %v1210_v27 }
 0x2bc   :  { %v1212_v61 = vmul.f32 0.2, %v1132_v21  ;;  %vm1180_vm11 = vcmp.gt.f32.partialorder %v1132_v21, 0.0 }
 0x2be   :  { %v1244_v53 = vsel %vm1180_vm11, %v1132_v21, %v1212_v61 }
 0x2c1   :  { %v1134_v33 = vpop.f32.mrf.mxu2 }
 0x2c2   :  { %v1135_v5 = vadd.f32 %v1134_v33, %v1046_v0 }
 0x2c4   :  { %v1213_v13 = vmul.f32 0.2, %v1135_v5  ;;  %vm1181_vm10 = vcmp.gt.f32.partialorder %v1135_v5, 0.0 }
 0x2c6   :  { %v1245_v7 = vsel %vm1181_vm10, %v1135_v5, %v1213_v13 }
 0x2c9   :  { %v1136_v48 = vpop.f32.mrf.mxu2 }
 0x2ca   :  { %v1137_v51 = vadd.f32 %v1136_v48, %v1048_v57 }
 0x2cc   :  { %v1214_v43 = vmul.f32 0.2, %v1137_v51  ;;  %vm1182_vm9 = vcmp.gt.f32.partialorder %v1137_v51, 0.0 }
 0x2ce   :  { %v1246_v38 = vsel %vm1182_vm9, %v1137_v51, %v1214_v43 }
 0x2d1   :  { %v1139_v63 = vpop.f32.mrf.mxu2 }
 0x2d2   :  { %v1140_v4 = vadd.f32 %v1139_v63, %v1051_v26 }
 0x2d4   :  { %v1215_v40 = vmul.f32 0.2, %v1140_v4  ;;  %vm1183_vm8 = vcmp.gt.f32.partialorder %v1140_v4, 0.0 }
 0x2d6   :  { %v1247_v60 = vsel %vm1183_vm8, %v1140_v4, %v1215_v40 }
 0x2d9   :  { %v1141_v8 = vpop.f32.mrf.mxu2 }
 0x2da   :  { %v1142_v44 = vadd.f32 %v1141_v8, %v1053_v42 }
 0x2dc   :  { %v1216_v31 = vmul.f32 0.2, %v1142_v44  ;;  %vm1184_vm7 = vcmp.gt.f32.partialorder %v1142_v44, 0.0 }
 0x2de   :  { %v1248_v35 = vsel %vm1184_vm7, %v1142_v44, %v1216_v31 }
 0x2df   :  { %1290 = vmatpush.msra.mxu3 %v1248_v35 }
 0x2e1   :  { %1291 = vmatpush.msra.mxu3 %v1247_v60 }
 0x2e3   :  { %1292 = vmatpush.msra.mxu3 %v1246_v38 }
 0x2e5   :  { %1293 = vmatpush.msra.mxu3 %v1245_v7 }
 0x2e7   :  { %1294 = vmatpush.msra.mxu3 %v1244_v53 }
 0x2e9   :  { %1295 = vmatpush.msra.mxu3 %v1243_v11 }
 0x2eb   :  { %1296 = vmatpush.msra.mxu3 %v1242_v59 }
 0x2ed   :  { %1297 = vmatpush.msra.mxu3 %v1241_v17 }
 0x2ef   :  { %1298 = vmatpush.msra.mxu3 %v1240_v1 }
 0x2f1   :  { %1299 = vmatpush.msra.mxu3 %v1239_v2 }
 0x2f2   :  { %1300 = vmatmul.f32.vlgmr.msra.gmra.mxu3 %v1256_v52 }
 0x331   :  { %v1281_v32 = vpop.f32.mrf.mxu3 }
 0x332   :  { %v1282_v41 = vadd.f32 %v1281_v32, %v1262_v9 }
 0x375   :  { %v1301_v47 = vpop.f32.mrf.mxu3 }
 0x376   :  { %v1302_v20 = vadd.f32 %v1301_v47, %v1282_v41 }
 0x378   :  { %v1548_v16 = vmul.f32 -1.442695, %v1302_v20 }
 0x37a   :  { %1625 = vpow2.f32 %v1548_v16 }
 0x380   :  { %v1626_v34 = vpop.eup %1625 }
 0x381   :  { %v1307_v45 = vadd.f32 1.0, %v1626_v34 }
 0x383   :  { %1627 = vrcp.f32 %v1307_v45  ;;  %v1319_v22 = vand.u32 2147483648, %v1307_v45  ;;  %v1317_v6 = vand.u32 2147483647, %v1307_v45  ;;  %vm1313_vm2 = vweird.f32 %v1307_v45 }
 0x385   :  { %v1320_v37 = vor.u32 1.1754944e-38, %v1319_v22  ;;  %vm1318_vm4 = vcmp.eq.f32.partialorder %v1317_v6, 8.507059e+37 }
 0x389   :  { %v1628_v46 = vpop.eup %1627 }
 0x38a   :  { %v1309_v14 = vmul.f32 %v1628_v46, %v1307_v45  ;;  %vm1314_vm1 = vweird.f32 %v1628_v46 }
 0x38b   :  { %vm1315_vm3 = vmor %vm1313_vm2, %vm1314_vm1 }
 0x38c   :  { %v1310_v24 = vsub.f32 1.0, %v1309_v14 }
 0x38e   :  { %v1311_v54 = vmul.f32 %v1628_v46, %v1310_v24 }
 0x390   :  { %v1312_v23 = vadd.f32 %v1628_v46, %v1311_v54 }
 0x392   :  { %v1316_v55 = vsel %vm1315_vm3, %v1628_v46, %v1312_v23 }
 0x393   :  { %v1321_v28 = vsel %vm1318_vm4, %v1320_v37, %v1316_v55 }
 0x394   :  { %1323 = vst [vmem:[#allocation3] sm:$0xff] %v1321_v28 }
 0x395   :  { %1334 = dma.vmem_to_hbm [thread:$0]  %s1330_s9, 128, %s1332_s12, [#allocation4]  }
 0x396   :  { %1653 = dma.done.wait [#allocation4], 128  }
 0x397   :  { %1654 = vsyncadd [#allocation4], 4294967168 }
 0x398   :  { %1339 = vsyncpa [#allocation4], 1 }

</bundles_post_ra>
